<compile_context>
chip_gen: v7x
topology: tpu7x:2x2x1
jax: 0.10.0
libtpu: 0.0.40
codegen_flags: <defaults>
</compile_context>

<pallas_src>
import functools
import numpy as np
import jax
import jax.numpy as jnp
from jax.experimental import pallas as pl
from jax.experimental.pallas import tpu as pltpu


def _round_up(a, b):
    return (a + b - 1) // b * b


# ----------------------------------------------------------------------------
# Degree-1 (linear) B-spline basis, replica of torch_spline_conv.
# ----------------------------------------------------------------------------
def spline_basis(pseudo, kernel_size, is_open_spline, degree=1):
    """pseudo: [E, D] float32 in [0,1]; returns (basis [E,S], weight_index [E,S])."""
    assert degree == 1  # TODO(synk): degree>1 (quadratic/cubic) basis not implemented
    E, D = pseudo.shape
    S = (degree + 1) ** D
    s_idx = jnp.arange(S)
    kmods = (s_idx[:, None] // ((degree + 1) ** jnp.arange(D))[None, :]) % (degree + 1)
    ks_f = kernel_size.astype(jnp.float32)
    open_f = is_open_spline.astype(jnp.float32)
    v = pseudo * (ks_f - degree * open_f)[None, :]                 # [E, D]
    vfloor = jnp.floor(v)
    frac = v - vfloor
    vfloor_i = vfloor.astype(jnp.int32)
    offset = jnp.concatenate(
        [jnp.ones((1,), jnp.int32), jnp.cumprod(kernel_size[:-1]).astype(jnp.int32)]
    )                                                              # [D]
    wi = jnp.sum(
        ((vfloor_i[:, None, :] + kmods[None, :, :]) % kernel_size[None, None, :])
        * offset[None, None, :],
        axis=-1,
    )                                                              # [E, S] int32
    kf = kmods[None, :, :].astype(jnp.float32)
    b = jnp.prod(1.0 - frac[:, None, :] - kf + 2.0 * frac[:, None, :] * kf, axis=-1)
    return b, wi


# ----------------------------------------------------------------------------
# Pass 1: per-edge spline contraction (hoisted out of the node-tile loop).
#   Z[e, :] = sum_k coef[e, k] * (x[col[e], :] @ W[k])
# Built in-kernel from coef/xcol tiles -> no [E, K*Cin] matrix ever hits HBM.
# ----------------------------------------------------------------------------
def _edge_transform_kernel(coef_ref, xcol_ref, w_ref, z_ref, *, n_k):
    x = xcol_ref[...]                                      # [TE, Cin] bf16
    acc = jnp.zeros(z_ref.shape, jnp.float32)              # [TE, Cout_pad] f32
    for k in range(n_k):                                   # unrolled, K small
        ak = coef_ref[:, k:k + 1] * x                      # [TE, Cin] bf16 (lane bcast)
        acc = acc + jnp.dot(ak, w_ref[k], preferred_element_type=jnp.float32)
    z_ref[...] = acc.astype(z_ref.dtype)                   # store bf16 for pass 2 MXU


# ----------------------------------------------------------------------------
# Pass 2: one-hot scatter-add over destination nodes (bf16 MXU) + norm/root/bias.
# ----------------------------------------------------------------------------
def _scatter_kernel(z_ref, row_ref, ids_ref, x_ref, root_ref, bias_ref,
                    invdeg_ref, o_ref, acc_ref):
    j = pl.program_id(1)                                   # edge tile (reduction axis)

    @pl.when(j == 0)
    def _():
        acc_ref[...] = jnp.zeros_like(acc_ref)

    # One-hot scatter rebuilt per tile from int32 ids; padded edges carry row = -1
    # and match no node.  bf16 operands (values are exactly 0/1), f32 accumulate.
    onehot = (ids_ref[...] == row_ref[...]).astype(jnp.bfloat16)    # [TN, TE]
    acc_ref[...] += jnp.dot(onehot, z_ref[...], preferred_element_type=jnp.float32)

    @pl.when(j == pl.num_programs(1) - 1)
    def _():
        out = acc_ref[...] * invdeg_ref[...]               # exact 1/clamp(deg,1)
        out = out + jnp.dot(x_ref[...], root_ref[...],
                            preferred_element_type=jnp.float32)
        out = out + bias_ref[...]
        o_ref[...] = out.astype(o_ref.dtype)


def spline_forward(x, edge_index, pseudo, weight, root, bias,
                   kernel_size, is_open_spline, degree=1, tn=256, te=1024):
    """Pallas-backed forward of Spline (norm=True, root_weight=True, bias=True)."""
    N, Cin = x.shape
    K, _, Cout = weight.shape
    E = edge_index.shape[1]

    if E == 0:                              # matches the torch short-circuit
        return x @ root + bias[None, :]

    row, col = edge_index[0].astype(jnp.int32), edge_index[1]

    # --- spline basis -> dense per-edge coefficients over the K spline kernels ----
    basis, wi = spline_basis(pseudo, kernel_size, is_open_spline, degree)   # [E, S]
    # Scatter-add into [E, K] (duplicate weight indices accumulate).
    coef = jnp.zeros((E, K), jnp.float32).at[jnp.arange(E)[:, None], wi].add(basis)

    # --- pad to TPU-friendly, lane-dense tiles ------------------------------------
    lane = 128
    Cout_pad = _round_up(Cout, lane)

    TE = min(te, _round_up(E, lane))
    E_pad = _round_up(E, TE)
    TN = min(tn, _round_up(N, 16))
    N_pad = _round_up(N, TN)

    coef_p = jnp.zeros((E_pad, K), jnp.bfloat16).at[:E].set(coef.astype(jnp.bfloat16))
    xcol_p = jnp.zeros((E_pad, Cin), jnp.bfloat16).at[:E].set(
        x[col].astype(jnp.bfloat16))
    w_p = jnp.zeros((K, Cin, Cout_pad), jnp.bfloat16).at[:, :, :Cout].set(
        weight.astype(jnp.bfloat16))
    row_p = jnp.full((1, E_pad), -1, jnp.int32).at[0, :E].set(row)   # -1 sentinel
    ids_p = jnp.arange(N_pad, dtype=jnp.int32).reshape(N_pad, 1)
    x_p = jnp.zeros((N_pad, Cin), jnp.bfloat16).at[:N].set(x.astype(jnp.bfloat16))
    root_p = jnp.zeros((Cin, Cout_pad), jnp.bfloat16).at[:, :Cout].set(
        root.astype(jnp.bfloat16))
    bias_p = jnp.zeros((1, Cout_pad), jnp.float32).at[0, :Cout].set(
        bias.astype(jnp.float32))

    deg = jax.ops.segment_sum(jnp.ones((E,), jnp.float32), row, num_segments=N)
    inv_deg = 1.0 / jnp.maximum(deg, 1.0)                   # exact (wrapper-side)
    invdeg_p = jnp.ones((N_pad, 1), jnp.float32).at[:N, 0].set(inv_deg)

    n_i = N_pad // TN
    n_j = E_pad // TE

    # ---------------- Pass 1: per-edge transform (computed exactly once) ----------
    edge_kernel = functools.partial(_edge_transform_kernel, n_k=K)
    z_p = pl.pallas_call(
        edge_kernel,
        out_shape=jax.ShapeDtypeStruct((E_pad, Cout_pad), jnp.bfloat16),
        grid_spec=pltpu.PrefetchScalarGridSpec(
            num_scalar_prefetch=0,
            grid=(n_j,),
            in_specs=[
                pl.BlockSpec((TE, K), lambda j: (j, 0)),              # coef
                pl.BlockSpec((TE, Cin), lambda j: (j, 0)),            # x[col]
                pl.BlockSpec((K, Cin, Cout_pad), lambda j: (0, 0, 0)),  # W
            ],
            out_specs=pl.BlockSpec((TE, Cout_pad), lambda j: (j, 0)),
        ),
        compiler_params=pltpu.CompilerParams(
            dimension_semantics=("parallel",),
            vmem_limit_bytes=32 * 1024 * 1024),
        cost_estimate=pl.CostEstimate(
            flops=int(2 * E_pad * K * Cin * Cout_pad + 2 * E_pad * K * Cin),
            transcendentals=0,
            bytes_accessed=int(E_pad * (K + Cin + Cout_pad) * 2
                               + K * Cin * Cout_pad * 2)),
    )(coef_p, xcol_p, w_p)

    # ---------------- Pass 2: scatter-add + degree norm + root + bias -------------
    out_p = pl.pallas_call(
        _scatter_kernel,
        out_shape=jax.ShapeDtypeStruct((N_pad, Cout_pad), jnp.float32),
        grid_spec=pltpu.PrefetchScalarGridSpec(
            num_scalar_prefetch=0,
            grid=(n_i, n_j),
            in_specs=[
                pl.BlockSpec((TE, Cout_pad), lambda i, j: (j, 0)),     # Z
                pl.BlockSpec((1, TE), lambda i, j: (0, j)),            # row (dst)
                pl.BlockSpec((TN, 1), lambda i, j: (i, 0)),            # node ids
                pl.BlockSpec((TN, Cin), lambda i, j: (i, 0)),          # x
                pl.BlockSpec((Cin, Cout_pad), lambda i, j: (0, 0)),    # root
                pl.BlockSpec((1, Cout_pad), lambda i, j: (0, 0)),      # bias
                pl.BlockSpec((TN, 1), lambda i, j: (i, 0)),            # inv_deg
            ],
            out_specs=pl.BlockSpec((TN, Cout_pad), lambda i, j: (i, 0)),
            scratch_shapes=[pltpu.VMEM((TN, Cout_pad), jnp.float32)],
        ),
        compiler_params=pltpu.CompilerParams(
            dimension_semantics=("parallel", "arbitrary"),
            vmem_limit_bytes=32 * 1024 * 1024),
        cost_estimate=pl.CostEstimate(
            flops=int(2 * N_pad * E_pad * Cout_pad + 2 * N_pad * Cin * Cout_pad),
            transcendentals=0,
            bytes_accessed=int(n_i * E_pad * (Cout_pad * 2 + 4)
                               + N_pad * (Cin * 2 + 4 + 4 + Cout_pad * 4)
                               + Cin * Cout_pad * 2 + Cout_pad * 4)),
    )(z_p, row_p, ids_p, x_p, root_p, bias_p, invdeg_p)

    return out_p[:N, :Cout].astype(x.dtype)


# ----------------------------------------------------------------------------
# Pure-JAX reference (mirrors the PyTorch forward) for a correctness check.
# ----------------------------------------------------------------------------
def spline_forward_ref(x, edge_index, pseudo, weight, root, bias,
                       kernel_size, is_open_spline, degree=1):
    N = x.shape[0]
    row, col = edge_index[0], edge_index[1]
    basis, wi = spline_basis(pseudo, kernel_size, is_open_spline, degree)
    w_e = weight[wi]                                           # [E, S, Cin, Cout]
    out_e = jnp.einsum('es,ec,esco->eo', basis, x[col], w_e)
    out = jax.ops.segment_sum(out_e, row, num_segments=N)
    deg = jax.ops.segment_sum(jnp.ones_like(row, dtype=x.dtype), row, num_segments=N)
    out = out / jnp.clip(deg, 1.0)[:, None]
    out = out + x @ root + bias[None, :]
    return out


# ----------------------------------------------------------------------------
# Driver
# ----------------------------------------------------------------------------
if __name__ == "__main__":
    # Module config (matches Spline.__init__ semantics)
    in_channels, out_channels = 8, 8
    dim = 2
    kernel_size_scalar = 3
    degree = 1
    N, E = 16, 40

    kernel_size = jnp.full((dim,), kernel_size_scalar, dtype=jnp.int32)
    is_open_spline = jnp.ones((dim,), dtype=jnp.int32)
    K = int(np.prod([kernel_size_scalar] * dim))               # = weight.size(0)

    key = jax.random.PRNGKey(0)
    k_w, k_r, k_b, k_x, k_e, k_p = jax.random.split(key, 6)

    # reset_parameters(): uniform(-1/sqrt(size), 1/sqrt(size)), size = Cin * K
    bound = 1.0 / np.sqrt(in_channels * K)
    weight = jax.random.uniform(k_w, (K, in_channels, out_channels),
                                jnp.float32, -bound, bound)
    root = jax.random.uniform(k_r, (in_channels, out_channels),
                              jnp.float32, -bound, bound)
    bias = jax.random.uniform(k_b, (out_channels,), jnp.float32, -bound, bound)

    # Inputs
    x = jax.random.normal(k_x, (N, in_channels), jnp.float32)
    edge_index = jax.random.randint(k_e, (2, E), 0, N, dtype=jnp.int32)
    pseudo = jax.random.uniform(k_p, (E, dim), jnp.float32, 0.0, 1.0)

    out = spline_forward(x, edge_index, pseudo, weight, root, bias,
                         kernel_size, is_open_spline, degree)
    out = jax.block_until_ready(out)

    ref = jax.block_until_ready(
        spline_forward_ref(x, edge_index, pseudo, weight, root, bias,
                           kernel_size, is_open_spline, degree))

    np.testing.assert_allclose(np.asarray(out), np.asarray(ref), rtol=1e-2, atol=1e-2)
    print("KERNEL_OK")
</pallas_src>

<mosaic_0001>
module attributes {stable_mosaic.version = 11 : i64} {
  func.func @_edge_transform_kernel(%arg0: i32, %arg1: memref<128x9xbf16, #tpu.memory_space<vmem>>, %arg2: memref<128x8xbf16, #tpu.memory_space<vmem>>, %arg3: memref<9x8x128xbf16, #tpu.memory_space<vmem>>, %arg4: memref<128x128xbf16, #tpu.memory_space<vmem>>) attributes {dimension_semantics = [#tpu.dimension_semantics<parallel>], iteration_bounds = array<i64: 1>, scalar_prefetch = 0 : i64, scratch_operands = 0 : i64, tpu.core_type = #tpu.core_type<tc>, window_params = [{transform_indices = @transform_0, window_bounds = array<i64: 128, 9>}, {transform_indices = @transform_1, window_bounds = array<i64: 128, 8>}, {pipeline_mode = #tpu.pipeline_mode<synchronous>, transform_indices = @transform_2, window_bounds = array<i64: 9, 8, 128>}, {transform_indices = @transform_3, window_bounds = array<i64: 128, 128>}]} {
    %c0 = arith.constant 0 : index
    %c0_0 = arith.constant 0 : index
    %0 = vector.load %arg2[%c0, %c0_0] : memref<128x8xbf16, #tpu.memory_space<vmem>>, vector<128x8xbf16>
    %cst = arith.constant 0.000000e+00 : f32
    %1 = vector.broadcast %cst : f32 to vector<128x128xf32>
    %c0_1 = arith.constant 0 : index
    %c0_2 = arith.constant 0 : index
    %2 = vector.load %arg1[%c0_1, %c0_2] : memref<128x9xbf16, #tpu.memory_space<vmem>>, vector<128x1xbf16>
    %3 = vector.broadcast %2 : vector<128x1xbf16> to vector<128x8xbf16>
    %4 = arith.mulf %3, %0 : vector<128x8xbf16>
    %c0_3 = arith.constant 0 : index
    %c0_4 = arith.constant 0 : index
    %c0_5 = arith.constant 0 : index
    %5 = vector.load %arg3[%c0_3, %c0_4, %c0_5] : memref<9x8x128xbf16, #tpu.memory_space<vmem>>, vector<1x8x128xbf16>
    %6 = vector.shape_cast %5 : vector<1x8x128xbf16> to vector<8x128xbf16>
    %cst_6 = arith.constant dense<0.000000e+00> : vector<128x128xf32>
    %7 = tpu.matmul %4, %6, %cst_6 {dimension_numbers = #tpu.dot_dimension_numbers<[1], [0], [0], [1], [0, 0, 1, 1], [], []>} : vector<128x8xbf16>, vector<8x128xbf16>, vector<128x128xf32> -> vector<128x128xf32>
    %8 = arith.addf %1, %7 : vector<128x128xf32>
    %c0_7 = arith.constant 0 : index
    %c1 = arith.constant 1 : index
    %9 = vector.load %arg1[%c0_7, %c1] : memref<128x9xbf16, #tpu.memory_space<vmem>>, vector<128x1xbf16>
    %10 = vector.broadcast %9 : vector<128x1xbf16> to vector<128x8xbf16>
    %11 = arith.mulf %10, %0 : vector<128x8xbf16>
    %c1_8 = arith.constant 1 : index
    %c0_9 = arith.constant 0 : index
    %c0_10 = arith.constant 0 : index
    %12 = vector.load %arg3[%c1_8, %c0_9, %c0_10] : memref<9x8x128xbf16, #tpu.memory_space<vmem>>, vector<1x8x128xbf16>
    %13 = vector.shape_cast %12 : vector<1x8x128xbf16> to vector<8x128xbf16>
    %cst_11 = arith.constant dense<0.000000e+00> : vector<128x128xf32>
    %14 = tpu.matmul %11, %13, %cst_11 {dimension_numbers = #tpu.dot_dimension_numbers<[1], [0], [0], [1], [0, 0, 1, 1], [], []>} : vector<128x8xbf16>, vector<8x128xbf16>, vector<128x128xf32> -> vector<128x128xf32>
    %15 = arith.addf %8, %14 : vector<128x128xf32>
    %c0_12 = arith.constant 0 : index
    %c2 = arith.constant 2 : index
    %16 = vector.load %arg1[%c0_12, %c2] : memref<128x9xbf16, #tpu.memory_space<vmem>>, vector<128x1xbf16>
    %17 = vector.broadcast %16 : vector<128x1xbf16> to vector<128x8xbf16>
    %18 = arith.mulf %17, %0 : vector<128x8xbf16>
    %c2_13 = arith.constant 2 : index
    %c0_14 = arith.constant 0 : index
    %c0_15 = arith.constant 0 : index
    %19 = vector.load %arg3[%c2_13, %c0_14, %c0_15] : memref<9x8x128xbf16, #tpu.memory_space<vmem>>, vector<1x8x128xbf16>
    %20 = vector.shape_cast %19 : vector<1x8x128xbf16> to vector<8x128xbf16>
    %cst_16 = arith.constant dense<0.000000e+00> : vector<128x128xf32>
    %21 = tpu.matmul %18, %20, %cst_16 {dimension_numbers = #tpu.dot_dimension_numbers<[1], [0], [0], [1], [0, 0, 1, 1], [], []>} : vector<128x8xbf16>, vector<8x128xbf16>, vector<128x128xf32> -> vector<128x128xf32>
    %22 = arith.addf %15, %21 : vector<128x128xf32>
    %c0_17 = arith.constant 0 : index
    %c3 = arith.constant 3 : index
    %23 = vector.load %arg1[%c0_17, %c3] : memref<128x9xbf16, #tpu.memory_space<vmem>>, vector<128x1xbf16>
    %24 = vector.broadcast %23 : vector<128x1xbf16> to vector<128x8xbf16>
    %25 = arith.mulf %24, %0 : vector<128x8xbf16>
    %c3_18 = arith.constant 3 : index
    %c0_19 = arith.constant 0 : index
    %c0_20 = arith.constant 0 : index
    %26 = vector.load %arg3[%c3_18, %c0_19, %c0_20] : memref<9x8x128xbf16, #tpu.memory_space<vmem>>, vector<1x8x128xbf16>
    %27 = vector.shape_cast %26 : vector<1x8x128xbf16> to vector<8x128xbf16>
    %cst_21 = arith.constant dense<0.000000e+00> : vector<128x128xf32>
    %28 = tpu.matmul %25, %27, %cst_21 {dimension_numbers = #tpu.dot_dimension_numbers<[1], [0], [0], [1], [0, 0, 1, 1], [], []>} : vector<128x8xbf16>, vector<8x128xbf16>, vector<128x128xf32> -> vector<128x128xf32>
    %29 = arith.addf %22, %28 : vector<128x128xf32>
    %c0_22 = arith.constant 0 : index
    %c4 = arith.constant 4 : index
    %30 = vector.load %arg1[%c0_22, %c4] : memref<128x9xbf16, #tpu.memory_space<vmem>>, vector<128x1xbf16>
    %31 = vector.broadcast %30 : vector<128x1xbf16> to vector<128x8xbf16>
    %32 = arith.mulf %31, %0 : vector<128x8xbf16>
    %c4_23 = arith.constant 4 : index
    %c0_24 = arith.constant 0 : index
    %c0_25 = arith.constant 0 : index
    %33 = vector.load %arg3[%c4_23, %c0_24, %c0_25] : memref<9x8x128xbf16, #tpu.memory_space<vmem>>, vector<1x8x128xbf16>
    %34 = vector.shape_cast %33 : vector<1x8x128xbf16> to vector<8x128xbf16>
    %cst_26 = arith.constant dense<0.000000e+00> : vector<128x128xf32>
    %35 = tpu.matmul %32, %34, %cst_26 {dimension_numbers = #tpu.dot_dimension_numbers<[1], [0], [0], [1], [0, 0, 1, 1], [], []>} : vector<128x8xbf16>, vector<8x128xbf16>, vector<128x128xf32> -> vector<128x128xf32>
    %36 = arith.addf %29, %35 : vector<128x128xf32>
    %c0_27 = arith.constant 0 : index
    %c5 = arith.constant 5 : index
    %37 = vector.load %arg1[%c0_27, %c5] : memref<128x9xbf16, #tpu.memory_space<vmem>>, vector<128x1xbf16>
    %38 = vector.broadcast %37 : vector<128x1xbf16> to vector<128x8xbf16>
    %39 = arith.mulf %38, %0 : vector<128x8xbf16>
    %c5_28 = arith.constant 5 : index
    %c0_29 = arith.constant 0 : index
    %c0_30 = arith.constant 0 : index
    %40 = vector.load %arg3[%c5_28, %c0_29, %c0_30] : memref<9x8x128xbf16, #tpu.memory_space<vmem>>, vector<1x8x128xbf16>
    %41 = vector.shape_cast %40 : vector<1x8x128xbf16> to vector<8x128xbf16>
    %cst_31 = arith.constant dense<0.000000e+00> : vector<128x128xf32>
    %42 = tpu.matmul %39, %41, %cst_31 {dimension_numbers = #tpu.dot_dimension_numbers<[1], [0], [0], [1], [0, 0, 1, 1], [], []>} : vector<128x8xbf16>, vector<8x128xbf16>, vector<128x128xf32> -> vector<128x128xf32>
    %43 = arith.addf %36, %42 : vector<128x128xf32>
    %c0_32 = arith.constant 0 : index
    %c6 = arith.constant 6 : index
    %44 = vector.load %arg1[%c0_32, %c6] : memref<128x9xbf16, #tpu.memory_space<vmem>>, vector<128x1xbf16>
    %45 = vector.broadcast %44 : vector<128x1xbf16> to vector<128x8xbf16>
    %46 = arith.mulf %45, %0 : vector<128x8xbf16>
    %c6_33 = arith.constant 6 : index
    %c0_34 = arith.constant 0 : index
    %c0_35 = arith.constant 0 : index
    %47 = vector.load %arg3[%c6_33, %c0_34, %c0_35] : memref<9x8x128xbf16, #tpu.memory_space<vmem>>, vector<1x8x128xbf16>
    %48 = vector.shape_cast %47 : vector<1x8x128xbf16> to vector<8x128xbf16>
    %cst_36 = arith.constant dense<0.000000e+00> : vector<128x128xf32>
    %49 = tpu.matmul %46, %48, %cst_36 {dimension_numbers = #tpu.dot_dimension_numbers<[1], [0], [0], [1], [0, 0, 1, 1], [], []>} : vector<128x8xbf16>, vector<8x128xbf16>, vector<128x128xf32> -> vector<128x128xf32>
    %50 = arith.addf %43, %49 : vector<128x128xf32>
    %c0_37 = arith.constant 0 : index
    %c7 = arith.constant 7 : index
    %51 = vector.load %arg1[%c0_37, %c7] : memref<128x9xbf16, #tpu.memory_space<vmem>>, vector<128x1xbf16>
    %52 = vector.broadcast %51 : vector<128x1xbf16> to vector<128x8xbf16>
    %53 = arith.mulf %52, %0 : vector<128x8xbf16>
    %c7_38 = arith.constant 7 : index
    %c0_39 = arith.constant 0 : index
    %c0_40 = arith.constant 0 : index
    %54 = vector.load %arg3[%c7_38, %c0_39, %c0_40] : memref<9x8x128xbf16, #tpu.memory_space<vmem>>, vector<1x8x128xbf16>
    %55 = vector.shape_cast %54 : vector<1x8x128xbf16> to vector<8x128xbf16>
    %cst_41 = arith.constant dense<0.000000e+00> : vector<128x128xf32>
    %56 = tpu.matmul %53, %55, %cst_41 {dimension_numbers = #tpu.dot_dimension_numbers<[1], [0], [0], [1], [0, 0, 1, 1], [], []>} : vector<128x8xbf16>, vector<8x128xbf16>, vector<128x128xf32> -> vector<128x128xf32>
    %57 = arith.addf %50, %56 : vector<128x128xf32>
    %c0_42 = arith.constant 0 : index
    %c8 = arith.constant 8 : index
    %58 = vector.load %arg1[%c0_42, %c8] : memref<128x9xbf16, #tpu.memory_space<vmem>>, vector<128x1xbf16>
    %59 = vector.broadcast %58 : vector<128x1xbf16> to vector<128x8xbf16>
    %60 = arith.mulf %59, %0 : vector<128x8xbf16>
    %c8_43 = arith.constant 8 : index
    %c0_44 = arith.constant 0 : index
    %c0_45 = arith.constant 0 : index
    %61 = vector.load %arg3[%c8_43, %c0_44, %c0_45] : memref<9x8x128xbf16, #tpu.memory_space<vmem>>, vector<1x8x128xbf16>
    %62 = vector.shape_cast %61 : vector<1x8x128xbf16> to vector<8x128xbf16>
    %cst_46 = arith.constant dense<0.000000e+00> : vector<128x128xf32>
    %63 = tpu.matmul %60, %62, %cst_46 {dimension_numbers = #tpu.dot_dimension_numbers<[1], [0], [0], [1], [0, 0, 1, 1], [], []>} : vector<128x8xbf16>, vector<8x128xbf16>, vector<128x128xf32> -> vector<128x128xf32>
    %64 = arith.addf %57, %63 : vector<128x128xf32>
    %65 = arith.truncf %64 : vector<128x128xf32> to vector<128x128xbf16>
    %c0_47 = arith.constant 0 : index
    %c0_48 = arith.constant 0 : index
    %66 = vector.load %arg4[%c0_47, %c0_48] : memref<128x128xbf16, #tpu.memory_space<vmem>>, vector<128x128xbf16>
    tpu.vector_store %arg4[%c0_47, %c0_48], %65 {strides = array<i32>} : memref<128x128xbf16, #tpu.memory_space<vmem>>, vector<128x128xbf16>,
    return
  }
  func.func @transform_0(%arg0: i32) -> (i32, i32) {
    %c0_i32 = arith.constant 0 : i32
    %c0_i32_0 = arith.constant 0 : i32
    return %arg0, %c0_i32 : i32, i32
  }
  func.func @transform_1(%arg0: i32) -> (i32, i32) {
    %c0_i32 = arith.constant 0 : i32
    %c0_i32_0 = arith.constant 0 : i32
    return %arg0, %c0_i32 : i32, i32
  }
  func.func @transform_2(%arg0: i32) -> (i32, i32, i32) {
    %c0_i32 = arith.constant 0 : i32
    %c0_i32_0 = arith.constant 0 : i32
    %c0_i32_1 = arith.constant 0 : i32
    %c0_i32_2 = arith.constant 0 : i32
    return %c0_i32, %c0_i32_0, %c0_i32_1 : i32, i32, i32
  }
  func.func @transform_3(%arg0: i32) -> (i32, i32) {
    %c0_i32 = arith.constant 0 : i32
    %c0_i32_0 = arith.constant 0 : i32
    return %arg0, %c0_i32 : i32, i32
  }
}

</mosaic_0001>

<bundles_post_ra>
// kernel: tpu_custom_call.1
= control target key start
LH: loop header
LB: loop body
LE: loop exit
PB: predicated region body
PF: predicated region fallthrough
CT: control target
= control target key end

     0   :  { %v4225_v2 = vmov 0   ;;  %s5277_s0 = inlined_call_operand.vmem [shape: bf16[128,9], index: 0, kind: input, shape index: {}]   ;;  %s5278_s1 = inlined_call_operand.vmem [shape: bf16[128,8], index: 1, kind: input, shape index: {}]   ;;  %s5279_s2 = inlined_call_operand.vmem [shape: bf16[9,8,128], index: 2, kind: input, shape index: {}]   ;;  %s5280_s3 = inlined_call_operand.hbm [shape: bf16[128,128], index: 3, kind: output, shape index: {}]  }
   0x1   :  { %v4261_v0 = vld [vmem:[%s5277_s0 + $0x8] sm:$0xf]  ;;  %v4266_v1 = vld [vmem:[%s5277_s0] sm:$0xf]  ;;  %4123 = vset.pattern.permute.xlu1 %v4225_v2  ;;  %4122 = vset.pattern.permute.xlu0 %v4225_v2  ;;  %v4273_v3 = vld [vmem:[%s5277_s0 + $0xc] sm:$0xf] }
   0x2   :  { %74 = vperm.xlu1 %4123, %v4261_v0   ;;  %50 = vperm.xlu0 %4122, %v4266_v1   ;;  %v4278_v4 = vld [vmem:[%s5277_s0 + $0x4] sm:$0xf]  ;;  %v4285_v5 = vld [vmem:[%s5277_s0 + $0x14] sm:$0xf]  ;;  %v4290_v6 = vld [vmem:[%s5277_s0 + $0x10] sm:$0xf] }
   0x6   :  { %86 = vperm.xlu1 %4123, %v4273_v3   ;;  %62 = vperm.xlu0 %4122, %v4278_v4  }
   0x7   :  { %8 = vsyncpa [#allocation3], 0  ;;  %v4297_v7 = vld [vmem:[%s5277_s0 + $0x1c] sm:$0xf]  ;;  %v4302_v8 = vld [vmem:[%s5277_s0 + $0x18] sm:$0xf]  ;;  %v56_v42 = vlaneseq }
   0x8   :  { %v4309_v9 = vld [vmem:[%s5277_s0 + $0x24] sm:$0xf]  ;;  %v4314_v10 = vld [vmem:[%s5277_s0 + $0x20] sm:$0xf]  ;;  %v4321_v11 = vld [vmem:[%s5277_s0 + $0x2c] sm:$0xf] }
   0x9   :  { %v4326_v12 = vld [vmem:[%s5277_s0 + $0x28] sm:$0xf]  ;;  %v4333_v13 = vld [vmem:[%s5277_s0 + $0x34] sm:$0xf]  ;;  %v4338_v14 = vld [vmem:[%s5277_s0 + $0x30] sm:$0xf] }
   0xa   :  { %110 = vperm.xlu1 %4123, %v4285_v5   ;;  %98 = vperm.xlu0 %4122, %v4290_v6   ;;  %v4345_v15 = vld [vmem:[%s5277_s0 + $0x3c] sm:$0xf]  ;;  %v4350_v16 = vld [vmem:[%s5277_s0 + $0x38] sm:$0xf]  ;;  %v4226_v17 = vmov 1   ;;  %vm516_vm0 = vcmask 1043456  }
   0xb   :  { %v3495_v18 = vld [vmem:[%s5279_s2 + $0x4] sm:$0xf]  ;;  %v5285_v20 = vmov 2   ;;  %v5281_v21 = vmov 4   ;;  %v4384_v22 = vld [vmem:[%s5279_s2] sm:$0xf] }
   0xc   :  { %4099 = vmatprep.subr.msk.bf16.mxu1 %vm516_vm0, %v3495_v18  ;;  %v518_v19 = vsel %vm516_vm0, %v3495_v18, 0  ;;  %v4229_v23 = vmov 5   ;;  %v4400_v24 = vld [vmem:[%s5279_s2 + $0x10] sm:$0xf]  ;;  %v4420_v26 = vld [vmem:[%s5279_s2 + $0x14] sm:$0xf] }
   0xd   :  { %3808 = vmatpush3.bf16.msra.mxu1 %v518_v19  ;;  %4103 = vmatprep.subr.msk.bf16.mxu0 %vm516_vm0, %v4400_v24  ;;  %v4406_v25 = vsel %vm516_vm0, %v4400_v24, 0  ;;  %v4230_v27 = vmov 6   ;;  %v4231_v40 = vmov 839922192   ;;  %v57_v46 = vshrl.u32 %v56_v42, 7 }
   0xe   :  { %134 = vperm.xlu1 %4123, %v4297_v7   ;;  %122 = vperm.xlu0 %4122, %v4302_v8   ;;  %v54_v41 = vunpack.c.l.s4 %v4231_v40  ;;  %v4490_v50 = vld [vmem:[%s5278_s1] sm:$0xf]  ;;  %v4495_v51 = vld [vmem:[%s5278_s1 + $0x4] sm:$0xf]  ;;  %vm491_vm1 = vcmask 64512  }
   0xf   :  { %4100 = vmatprep.subr.msk.bf16.mxu1 %vm516_vm0, %v4384_v22  ;;  %3880 = vmatpush3.bf16.msra.mxu0 %v4406_v25  ;;  %v4510_v63 = vld [vmem:[%s5278_s1 + $0x8] sm:$0xf]  ;;  %v4515_v2 = vld [vmem:[%s5278_s1 + $0xc] sm:$0xf] }
  0x10   :  { %4105 = vmatprep.subr.msk.bf16.mxu0 %vm516_vm0, %v4420_v26  ;;  %v55_v45 = vunpack.c.0.s8 %v54_v41 }
  0x12   :  { %158 = vperm.xlu1 %4123, %v4309_v9   ;;  %146 = vperm.xlu0 %4122, %v4314_v10   ;;  %v4485_v49 = vsub.s32 %v55_v45, %v57_v46  ;;  %v5283_v45 = vmov 7   ;;  %v682_v46 = vsel %vm516_vm0, %v4384_v22, 0 }
  0x16   :  { %182 = vperm.xlu1 %4123, %v4321_v11   ;;  %170 = vperm.xlu0 %4122, %v4326_v12  }
  0x1a   :  { %206 = vperm.xlu1 %4123, %v4333_v13   ;;  %194 = vperm.xlu0 %4122, %v4338_v14  }
  0x1e   :  { %230 = vperm.xlu1 %4123, %v4345_v15   ;;  %218 = vperm.xlu0 %4122, %v4350_v16  }
  0x22   :  { %4125 = vset.pattern.permute.xlu1 %v4226_v17  ;;  %4124 = vset.pattern.permute.xlu0 %v4226_v17 }
  0x23   :  { %269 = vperm.xlu1 %4125, %v4278_v4   ;;  %258 = vperm.xlu0 %4124, %v4266_v1  }
  0x27   :  { %280 = vperm.xlu1 %4125, %v4261_v0   ;;  %291 = vperm.xlu0 %4124, %v4273_v3  }
  0x2b   :  { %302 = vperm.xlu1 %4125, %v4290_v6   ;;  %313 = vperm.xlu0 %4124, %v4285_v5  }
  0x2f   :  { %324 = vperm.xlu1 %4125, %v4302_v8   ;;  %335 = vperm.xlu0 %4124, %v4297_v7  }
  0x33   :  { %346 = vperm.xlu1 %4125, %v4314_v10   ;;  %357 = vperm.xlu0 %4124, %v4309_v9  }
  0x37   :  { %368 = vperm.xlu1 %4125, %v4326_v12   ;;  %379 = vperm.xlu0 %4124, %v4321_v11  }
  0x3b   :  { %390 = vperm.xlu1 %4125, %v4338_v14   ;;  %401 = vperm.xlu0 %4124, %v4333_v13  }
  0x3f   :  { %412 = vperm.xlu1 %4125, %v4350_v16   ;;  %423 = vperm.xlu0 %4124, %v4345_v15  }
  0x43   :  { %4126 = vset.pattern.permute.xlu1 %v5285_v20  ;;  %4128 = vset.pattern.permute.xlu0 %v5281_v21 }
  0x44   :  { %782 = vperm.xlu1 %4126, %v4266_v1   ;;  %1541 = vperm.xlu0 %4128, %v4278_v4  }
  0x48   :  { %804 = vperm.xlu1 %4126, %v4261_v0   ;;  %1574 = vperm.xlu0 %4128, %v4290_v6  }
  0x4c   :  { %815 = vperm.xlu1 %4126, %v4273_v3   ;;  %1596 = vperm.xlu0 %4128, %v4302_v8  }
  0x50   :  { %4127 = vset.pattern.permute.xlu1 %v5281_v21  ;;  %4129 = vset.pattern.permute.xlu0 %v4229_v23 }
  0x51   :  { %1530 = vperm.xlu1 %4127, %v4266_v1   ;;  %1904 = vperm.xlu0 %4129, %v4266_v1  }
  0x55   :  { %1552 = vperm.xlu1 %4127, %v4261_v0   ;;  %1937 = vperm.xlu0 %4129, %v4273_v3  }
  0x59   :  { %1563 = vperm.xlu1 %4127, %v4273_v3   ;;  %1959 = vperm.xlu0 %4129, %v4285_v5  }
  0x5d   :  { %1585 = vperm.xlu1 %4127, %v4285_v5   ;;  %1981 = vperm.xlu0 %4129, %v4297_v7  }
  0x61   :  { %1607 = vperm.xlu1 %4127, %v4297_v7   ;;  %2003 = vperm.xlu0 %4129, %v4309_v9  }
  0x65   :  { %4130 = vset.pattern.permute.xlu1 %v4229_v23  ;;  %2025 = vperm.xlu0 %4129, %v4321_v11  }
  0x66   :  { %1915 = vperm.xlu1 %4130, %v4278_v4  }
  0x69   :  { %2047 = vperm.xlu0 %4129, %v4333_v13  }
  0x6a   :  { %1926 = vperm.xlu1 %4130, %v4261_v0  }
  0x6d   :  { %2069 = vperm.xlu0 %4129, %v4345_v15  }
  0x6e   :  { %1948 = vperm.xlu1 %4130, %v4290_v6  }
  0x71   :  { %4132 = vset.pattern.permute.xlu0 %v4230_v27 }
  0x72   :  { %1970 = vperm.xlu1 %4130, %v4302_v8   ;;  %2289 = vperm.xlu0 %4132, %v4278_v4  }
  0x76   :  { %1992 = vperm.xlu1 %4130, %v4314_v10   ;;  %2322 = vperm.xlu0 %4132, %v4290_v6  }
  0x7a   :  { %2014 = vperm.xlu1 %4130, %v4326_v12   ;;  %2344 = vperm.xlu0 %4132, %v4302_v8  }
  0x7e   :  { %2036 = vperm.xlu1 %4130, %v4338_v14   ;;  %2366 = vperm.xlu0 %4132, %v4314_v10  }
  0x81   :  { %v4435_v28 = vpop.permute.xlu1 %74  ;;  %v4437_v29 = vpop.permute.xlu0 %50 }
  0x82   :  { %2058 = vperm.xlu1 %4130, %v4350_v16   ;;  %2388 = vperm.xlu0 %4132, %v4326_v12  }
  0x85   :  { %v4441_v30 = vpop.permute.xlu1 %86  ;;  %v4443_v31 = vpop.permute.xlu0 %62 }
  0x86   :  { %4131 = vset.pattern.permute.xlu1 %v4230_v27  ;;  %2432 = vperm.xlu0 %4132, %v4350_v16  }
  0x87   :  { %2278 = vperm.xlu1 %4131, %v4266_v1  }
  0x89   :  { %v4448_v32 = vpop.permute.xlu1 %110  ;;  %v4450_v33 = vpop.permute.xlu0 %98 }
  0x8a   :  { %4134 = vset.pattern.permute.xlu0 %v5285_v20 }
  0x8b   :  { %2300 = vperm.xlu1 %4131, %v4261_v0   ;;  %793 = vperm.xlu0 %4134, %v4278_v4  }
  0x8d   :  { %v4455_v34 = vpop.permute.xlu1 %134  ;;  %v4457_v35 = vpop.permute.xlu0 %122 }
  0x8f   :  { %2311 = vperm.xlu1 %4131, %v4273_v3   ;;  %826 = vperm.xlu0 %4134, %v4290_v6  }
  0x91   :  { %v4461_v36 = vpop.permute.xlu1 %158  ;;  %v4463_v37 = vpop.permute.xlu0 %146 }
  0x93   :  { %2333 = vperm.xlu1 %4131, %v4285_v5   ;;  %837 = vperm.xlu0 %4134, %v4285_v5  }
  0x95   :  { %v4467_v38 = vpop.permute.xlu1 %182  ;;  %v4469_v39 = vpop.permute.xlu0 %170 }
  0x97   :  { %2355 = vperm.xlu1 %4131, %v4297_v7   ;;  %848 = vperm.xlu0 %4134, %v4302_v8  }
  0x99   :  { %v4473_v43 = vpop.permute.xlu1 %206  ;;  %v4475_v44 = vpop.permute.xlu0 %194 }
  0x9b   :  { %2377 = vperm.xlu1 %4131, %v4309_v9   ;;  %881 = vperm.xlu0 %4134, %v4309_v9  }
  0x9d   :  { %v4479_v47 = vpop.permute.xlu1 %230  ;;  %v4481_v48 = vpop.permute.xlu0 %218 }
  0x9f   :  { %2399 = vperm.xlu1 %4131, %v4321_v11   ;;  %892 = vperm.xlu0 %4134, %v4326_v12  }
  0xa2   :  { %v270_v52 = vpop.permute.xlu1 %269  ;;  %v259_v53 = vpop.permute.xlu0 %258 }
  0xa3   :  { %v278_v54 = vrot.slane %v270_v52, %v4485_v49  ;;  %v267_v55 = vrot.slane %v259_v53, %v4485_v49  ;;  %2410 = vperm.xlu1 %4131, %v4338_v14   ;;  %925 = vperm.xlu0 %4134, %v4333_v13   ;;  %v4529_v52 = vld [vmem:[%s5278_s1 + $0x14] sm:$0xf]  ;;  %v4534_v53 = vld [vmem:[%s5278_s1 + $0x10] sm:$0xf] }
  0xa5   :  { %v433_v56 = vmul.bf16 %v267_v55, %v4490_v50  ;;  %v434_v57 = vmul.bf16 %v278_v54, %v4495_v51  ;;  %v4541_v54 = vld [vmem:[%s5279_s2 + $0x8] sm:$0xf] }
  0xa6   :  { %v281_v58 = vpop.permute.xlu1 %280  ;;  %v292_v59 = vpop.permute.xlu0 %291 }
  0xa7   :  { %v289_v60 = vrot.slane %v281_v58, %v4485_v49  ;;  %v300_v61 = vrot.slane %v292_v59, %v4485_v49  ;;  %2421 = vperm.xlu1 %4131, %v4333_v13   ;;  %v3496_v62 = vcombine.low %v433_v56, %v434_v57  ;;  %936 = vperm.xlu0 %4134, %v4350_v16  }
  0xa9   :  { %v435_v17 = vmul.bf16 %v289_v60, %v4510_v63  ;;  %v436_v18 = vmul.bf16 %v300_v61, %v4515_v2  ;;  %3809 = vmatprep.mubr.msk.bf16.mxu1 %vm491_vm1, %v3496_v62  ;;  %v4553_v61 = vld [vmem:[%s5278_s1 + $0x1c] sm:$0xf]  ;;  %v4558_v62 = vld [vmem:[%s5278_s1 + $0x18] sm:$0xf] }
  0xaa   :  { %v303_v19 = vpop.permute.xlu1 %302  ;;  %v314_v23 = vpop.permute.xlu0 %313 }
  0xab   :  { %v3497_v40 = vcombine.low %v435_v17, %v436_v18  ;;  %v311_v41 = vrot.slane %v303_v19, %v4485_v49  ;;  %v322_v42 = vrot.slane %v314_v23, %v4485_v49  ;;  %4133 = vset.pattern.permute.xlu1 %v5285_v20  ;;  %4142 = vset.pattern.permute.xlu0 %v5283_v45 }
  0xac   :  { %859 = vperm.xlu1 %4133, %v4297_v7   ;;  %2674 = vperm.xlu0 %4142, %v4261_v0  }
  0xad   :  { %v437_v22 = vmul.bf16 %v311_v41, %v4534_v53  ;;  %v438_v55 = vmul.bf16 %v322_v42, %v4529_v52  ;;  %3810 = vmatmul.mubr.msk.bf16.vlgmr.msra.gmra.mrb[0].mxu1 %vm491_vm1, %v3497_v40 }
  0xae   :  { %v325_v56 = vpop.permute.xlu1 %324  ;;  %v336_v57 = vpop.permute.xlu0 %335  ;;  %3826 = vmatpush3.bf16.msra.mxu1 %v682_v46  ;;  %v4576_v46 = vld [vmem:[%s5278_s1 + $0x20] sm:$0xf] }
  0xaf   :  { %v3498_v58 = vcombine.low %v437_v22, %v438_v55  ;;  %v333_v59 = vrot.slane %v325_v56, %v4485_v49  ;;  %v344_v60 = vrot.slane %v336_v57, %v4485_v49  ;;  %4101 = vmatprep.subr.msk.bf16.mxu1 %vm516_vm0, %v4541_v54 }
  0xb0   :  { %4135 = vset.pattern.permute.xlu1 %v4230_v27  ;;  %2718 = vperm.xlu0 %4142, %v4302_v8   ;;  %v4571_v27 = vld [vmem:[%s5278_s1 + $0x24] sm:$0xf] }
  0xb1   :  { %v439_v17 = vmul.bf16 %v333_v59, %v4558_v62  ;;  %v440_v18 = vmul.bf16 %v344_v60, %v4553_v61  ;;  %2443 = vperm.xlu1 %4135, %v4345_v15   ;;  %3813 = vmatprep.mubr.msk.bf16.mxu1 %vm491_vm1, %v3498_v58 }
  0xb2   :  { %v347_v19 = vpop.permute.xlu1 %346  ;;  %v358_v23 = vpop.permute.xlu0 %357 }
  0xb3   :  { %v3499_v40 = vcombine.low %v439_v17, %v440_v18  ;;  %v355_v41 = vrot.slane %v347_v19, %v4485_v49  ;;  %v366_v42 = vrot.slane %v358_v23, %v4485_v49  ;;  %v4589_v17 = vld [vmem:[%s5278_s1 + $0x2c] sm:$0xf]  ;;  %v4594_v18 = vld [vmem:[%s5278_s1 + $0x28] sm:$0xf] }
  0xb4   :  { %2762 = vperm.xlu0 %4142, %v4326_v12  }
  0xb5   :  { %v441_v22 = vmul.bf16 %v355_v41, %v4576_v46  ;;  %v442_v55 = vmul.bf16 %v366_v42, %v4571_v27  ;;  %4136 = vset.pattern.permute.xlu1 %v5285_v20  ;;  %3814 = vmatmul.mubr.msk.bf16.gmra.mrb[4].mxu1 %vm491_vm1, %v3499_v40  ;;  %v59_v40 = vrot.slane %v4437_v29, %v4485_v49  ;;  %v4616_v29 = vld [vmem:[%s5278_s1 + $0x30] sm:$0xf] }
  0xb6   :  { %v369_v56 = vpop.permute.xlu1 %368  ;;  %870 = vperm.xlu1 %4136, %v4314_v10   ;;  %v380_v57 = vpop.permute.xlu0 %379  ;;  %v71_v41 = vrot.slane %v4443_v31, %v4485_v49  ;;  %v5287_v31 = vmov 3  }
  0xb7   :  { %v3500_v58 = vcombine.low %v441_v22, %v442_v55  ;;  %v377_v59 = vrot.slane %v369_v56, %v4485_v49  ;;  %v388_v60 = vrot.slane %v380_v57, %v4485_v49 }
  0xb8   :  { %2806 = vperm.xlu0 %4142, %v4350_v16  }
  0xb9   :  { %v443_v19 = vmul.bf16 %v377_v59, %v4594_v18  ;;  %v444_v23 = vmul.bf16 %v388_v60, %v4589_v17  ;;  %3817 = vmatprep.mubr.msk.bf16.mxu1 %vm491_vm1, %v3500_v58  ;;  %v4611_v58 = vld [vmem:[%s5278_s1 + $0x34] sm:$0xf] }
  0xba   :  { %v391_v42 = vpop.permute.xlu1 %390  ;;  %4137 = vset.pattern.permute.xlu1 %v5283_v45  ;;  %v402_v22 = vpop.permute.xlu0 %401 }
  0xbb   :  { %v3501_v55 = vcombine.low %v443_v19, %v444_v23  ;;  %v399_v56 = vrot.slane %v391_v42, %v4485_v49  ;;  %v410_v57 = vrot.slane %v402_v22, %v4485_v49  ;;  %2652 = vperm.xlu1 %4137, %v4266_v1   ;;  %v240_v19 = vmul.bf16 %v59_v40, %v4490_v50  ;;  %v4636_v40 = vld [vmem:[%s5278_s1 + $0x38] sm:$0xf] }
  0xbc   :  { %4152 = vset.pattern.permute.xlu0 %v5287_v31  ;;  %v241_v23 = vmul.bf16 %v71_v41, %v4495_v51  ;;  %v119_v31 = vrot.slane %v4448_v32, %v4485_v49 }
  0xbd   :  { %v445_v59 = vmul.bf16 %v399_v56, %v4616_v29  ;;  %v446_v60 = vmul.bf16 %v410_v57, %v4611_v58  ;;  %3818 = vmatmul.mubr.msk.bf16.gmra.mrb[8].mxu1 %vm491_vm1, %v3501_v55  ;;  %1167 = vperm.xlu0 %4152, %v4278_v4   ;;  %v4631_v56 = vld [vmem:[%s5278_s1 + $0x3c] sm:$0xf] }
  0xbe   :  { %v413_v42 = vpop.permute.xlu1 %412  ;;  %v424_v22 = vpop.permute.xlu0 %423  ;;  %v3512_v57 = vcombine.low %v240_v19, %v241_v23  ;;  %v245_v32 = vmul.bf16 %v119_v31, %v4529_v52  ;;  %v5290_v23 = vmov 7  }
  0xbf   :  { %v3502_v21 = vcombine.low %v445_v59, %v446_v60  ;;  %v421_v45 = vrot.slane %v413_v42, %v4485_v49  ;;  %v432_v20 = vrot.slane %v424_v22, %v4485_v49  ;;  %2663 = vperm.xlu1 %4137, %v4278_v4   ;;  %v95_v4 = vrot.slane %v4441_v30, %v4485_v49 }
  0xc0   :  { %v5289_v60 = vmov 2  }
  0xc1   :  { %v447_v41 = vmul.bf16 %v421_v45, %v4636_v40  ;;  %v448_v55 = vmul.bf16 %v432_v20, %v4631_v56  ;;  %3821 = vmatprep.mubr.msk.bf16.mxu1 %vm491_vm1, %v3502_v21  ;;  %1178 = vperm.xlu0 %4152, %v4261_v0   ;;  %v107_v20 = vrot.slane %v4450_v33, %v4485_v49 }
  0xc2   :  { %v83_v21 = vrot.slane %v4435_v28, %v4485_v49  ;;  %v243_v30 = vmul.bf16 %v95_v4, %v4515_v2 }
  0xc3   :  { %v3503_v59 = vcombine.low %v447_v41, %v448_v55  ;;  %4138 = vset.pattern.permute.xlu1 %v5289_v60  ;;  %v4645_v42 = vpop.permute.xlu1 %782  ;;  %v1542_v22 = vpop.permute.xlu0 %1541  ;;  %v244_v33 = vmul.bf16 %v107_v20, %v4534_v53  ;;  %v143_v55 = vrot.slane %v4455_v34, %v4485_v49  ;;  %v167_v20 = vrot.slane %v4461_v36, %v4485_v49 }
  0xc4   :  { %903 = vperm.xlu1 %4138, %v4321_v11   ;;  %v242_v28 = vmul.bf16 %v83_v21, %v4510_v63  ;;  %v155_v21 = vrot.slane %v4463_v37, %v4485_v49 }
  0xc5   :  { %3822 = vmatmul.mubr.msk.bf16.gmra.mrb[12].mxu1 %vm491_vm1, %v3503_v59  ;;  %1211 = vperm.xlu0 %4152, %v4285_v5   ;;  %v3514_v59 = vcombine.low %v244_v33, %v245_v32  ;;  %v247_v34 = vmul.bf16 %v143_v55, %v4553_v61  ;;  %v249_v36 = vmul.bf16 %v167_v20, %v4571_v27 }
  0xc6   :  { %3827 = vmatprep.mubr.msk.bf16.mxu1 %vm491_vm1, %v3512_v57  ;;  %v3513_v41 = vcombine.low %v242_v28, %v243_v30  ;;  %v131_v57 = vrot.slane %v4457_v35, %v4485_v49  ;;  %v1040_v30 = vsel %vm516_vm0, %v4541_v54, 0  ;;  %v1550_v28 = vrot.slane %v1542_v22, %v4485_v49 }
  0xc7   :  { %v4658_v45 = vpop.permute.xlu1 %804  ;;  %v4660_v19 = vpop.permute.xlu0 %1574  ;;  %v248_v37 = vmul.bf16 %v155_v21, %v4576_v46  ;;  %v179_v55 = vrot.slane %v4469_v39, %v4485_v49  ;;  %v215_v21 = vrot.slane %v4473_v43, %v4485_v49 }
  0xc8   :  { %4139 = vset.pattern.permute.xlu1 %v5290_v23  ;;  %v246_v35 = vmul.bf16 %v131_v57, %v4558_v62  ;;  %v1706_v32 = vmul.bf16 %v1550_v28, %v4495_v51 }
  0xc9   :  { %2685 = vperm.xlu1 %4139, %v4273_v3   ;;  %1222 = vperm.xlu0 %4152, %v4302_v8   ;;  %v3516_v20 = vcombine.low %v248_v37, %v249_v36  ;;  %v253_v43 = vmul.bf16 %v215_v21, %v4611_v58 }
  0xca   :  { %v3515_v57 = vcombine.low %v246_v35, %v247_v34  ;;  %v250_v35 = vmul.bf16 %v179_v55, %v4594_v18  ;;  %v227_v55 = vrot.slane %v4481_v48, %v4485_v49 }
  0xcb   :  { %v4672_v4 = vpop.permute.xlu1 %815  ;;  %v4674_v31 = vpop.permute.xlu0 %1596 }
  0xcc   :  { %v1605_v48 = vrot.slane %v4674_v31, %v4485_v49 }
  0xcd   :  { %4140 = vset.pattern.permute.xlu1 %v5289_v60  ;;  %3828 = vmatmul.mubr.msk.bf16.vlgmr.msra.gmra.mrb[0].mxu1 %vm491_vm1, %v3513_v41  ;;  %v191_v41 = vrot.slane %v4467_v38, %v4485_v49 }
  0xce   :  { %914 = vperm.xlu1 %4140, %v4338_v14   ;;  %3831 = vmatprep.mubr.msk.bf16.mxu1 %vm491_vm1, %v3514_v59 }
  0xcf   :  { %3844 = vmatpush3.bf16.msra.mxu1 %v1040_v30  ;;  %1255 = vperm.xlu0 %4152, %v4309_v9   ;;  %v203_v30 = vrot.slane %v4475_v44, %v4485_v49  ;;  %v251_v34 = vmul.bf16 %v191_v41, %v4589_v17 }
  0xd0   :  { %v1531_v54 = vpop.permute.xlu1 %1530  ;;  %v4692_v22 = vpop.permute.xlu0 %1904 }
  0xd1   :  { %v1539_v33 = vrot.slane %v1531_v54, %v4485_v49  ;;  %v252_v44 = vmul.bf16 %v203_v30, %v4616_v29  ;;  %v3517_v41 = vcombine.low %v250_v35, %v251_v34  ;;  %v2162_v30 = vsel %vm516_vm0, %v4420_v26, 0 }
  0xd2   :  { %4141 = vset.pattern.permute.xlu1 %v5290_v23  ;;  %v254_v34 = vmul.bf16 %v227_v55, %v4636_v40 }
  0xd3   :  { %2696 = vperm.xlu1 %4141, %v4290_v6   ;;  %v1705_v59 = vmul.bf16 %v1539_v33, %v4490_v50  ;;  %1266 = vperm.xlu0 %4152, %v4326_v12  }
  0xd4   :  { %v1553_v38 = vpop.permute.xlu1 %1552  ;;  %v4708_v28 = vpop.permute.xlu0 %1937 }
  0xd5   :  { %3832 = vmatmul.mubr.msk.bf16.gmra.mrb[4].mxu1 %vm491_vm1, %v3515_v57  ;;  %v3563_v39 = vcombine.low %v1705_v59, %v1706_v32  ;;  %v1561_v36 = vrot.slane %v1553_v38, %v4485_v49  ;;  %v1583_v32 = vrot.slane %v4660_v19, %v4485_v49 }
  0xd6   :  { %3835 = vmatprep.mubr.msk.bf16.mxu1 %vm491_vm1, %v3516_v20  ;;  %v3518_v20 = vcombine.low %v252_v44, %v253_v43  ;;  %v1711_v43 = vmul.bf16 %v1605_v48, %v4558_v62 }
  0xd7   :  { %2707 = vperm.xlu1 %4141, %v4285_v5   ;;  %3881 = vmatprep.mubr.msk.bf16.mxu0 %vm491_vm1, %v3563_v39  ;;  %v239_v5 = vrot.slane %v4479_v47, %v4485_v49  ;;  %v1707_v57 = vmul.bf16 %v1561_v36, %v4510_v63  ;;  %v1709_v47 = vmul.bf16 %v1583_v32, %v4534_v53 }
  0xd8   :  { %v1564_v37 = vpop.permute.xlu1 %1563  ;;  %v4719_v54 = vpop.permute.xlu0 %1959  ;;  %1299 = vperm.xlu0 %4152, %v4333_v13   ;;  %v1913_v32 = vrot.slane %v4692_v22, %v4485_v49 }
  0xd9   :  { %v1572_v33 = vrot.slane %v1564_v37, %v4485_v49  ;;  %v255_v26 = vmul.bf16 %v239_v5, %v4631_v56 }
  0xda   :  { %v2079_v22 = vmul.bf16 %v1913_v32, %v4490_v50  ;;  %v4797_v32 = vld [vmem:[%s5279_s2 + $0x1c] sm:$0xf] }
  0xdb   :  { %v1708_v59 = vmul.bf16 %v1572_v33, %v4515_v2  ;;  %4143 = vset.pattern.permute.xlu1 %v5289_v60  ;;  %v3596_v60 = vld [vmem:[%s5279_s2 + $0x18] sm:$0xf]  ;;  %v4234_v33 = vmov 8  }
  0xdc   :  { %947 = vperm.xlu1 %4143, %v4345_v15   ;;  %v1586_v21 = vpop.permute.xlu1 %1585  ;;  %v4733_v19 = vpop.permute.xlu0 %1981  ;;  %1310 = vperm.xlu0 %4152, %v4350_v16  }
  0xdd   :  { %v3564_v38 = vcombine.low %v1707_v57, %v1708_v59  ;;  %v1594_v39 = vrot.slane %v1586_v21, %v4485_v49  ;;  %3836 = vmatmul.mubr.msk.bf16.gmra.mrb[8].mxu1 %vm491_vm1, %v3517_v41  ;;  %v3519_v41 = vcombine.low %v254_v34, %v255_v26  ;;  %v5291_v59 = vmov 3  }
  0xde   :  { %3839 = vmatprep.mubr.msk.bf16.mxu1 %vm491_vm1, %v3518_v20  ;;  %v1946_v21 = vrot.slane %v4708_v28, %v4485_v49 }
  0xdf   :  { %v1710_v35 = vmul.bf16 %v1594_v39, %v4529_v52  ;;  %3882 = vmatmul.mubr.msk.bf16.vlgmr.msra.gmra.mrb[0].mxu0 %vm491_vm1, %v3564_v38  ;;  %v1968_v39 = vrot.slane %v4719_v54, %v4485_v49  ;;  %v1990_v54 = vrot.slane %v4733_v19, %v4485_v49 }
  0xe0   :  { %4144 = vset.pattern.permute.xlu1 %v5290_v23  ;;  %v1608_v31 = vpop.permute.xlu1 %1607  ;;  %v4752_v36 = vpop.permute.xlu0 %2003  ;;  %3898 = vmatpush3.bf16.msra.mxu0 %v2162_v30  ;;  %v2082_v38 = vmul.bf16 %v1946_v21, %v4515_v2 }
  0xe1   :  { %v3565_v44 = vcombine.low %v1709_v47, %v1710_v35  ;;  %v1616_v37 = vrot.slane %v1608_v31, %v4485_v49  ;;  %2729 = vperm.xlu1 %4144, %v4297_v7   ;;  %4106 = vmatprep.subr.msk.bf16.mxu0 %vm516_vm0, %v3596_v60  ;;  %v2536_v35 = vsel %vm516_vm0, %v3596_v60, 0  ;;  %v2084_v31 = vmul.bf16 %v1968_v39, %v4529_v52 }
  0xe2   :  { %4160 = vset.pattern.permute.xlu0 %v4234_v33 }
  0xe3   :  { %v1712_v5 = vmul.bf16 %v1616_v37, %v4553_v61  ;;  %3885 = vmatprep.mubr.msk.bf16.mxu0 %vm491_vm1, %v3565_v44  ;;  %3048 = vperm.xlu0 %4160, %v4261_v0   ;;  %v5292_v37 = vmov 4  }
  0xe4   :  { %v4764_v55 = vpop.permute.xlu0 %2025 }
  0xe5   :  { %v3566_v57 = vcombine.low %v1711_v43, %v1712_v5  ;;  %4145 = vset.pattern.permute.xlu1 %v5291_v59  ;;  %v1916_v20 = vpop.permute.xlu1 %1915  ;;  %3840 = vmatmul.mubr.msk.bf16.gmra.mrb[12].mxu1 %vm491_vm1, %v3519_v41  ;;  %v2086_v5 = vmul.bf16 %v1990_v54, %v4553_v61 }
  0xe6   :  { %v1924_v30 = vrot.slane %v1916_v20, %v4485_v49  ;;  %1156 = vperm.xlu1 %4145, %v4266_v1  }
  0xe7   :  { %3886 = vmatmul.mubr.msk.bf16.gmra.mrb[4].mxu0 %vm491_vm1, %v3566_v57  ;;  %3092 = vperm.xlu0 %4160, %v4302_v8   ;;  %v2012_v57 = vrot.slane %v4752_v36, %v4485_v49  ;;  %v4818_v36 = vld [vmem:[%s5279_s2 + $0xc] sm:$0xf] }
  0xe8   :  { %v2080_v0 = vmul.bf16 %v1924_v30, %v4495_v51  ;;  %v4776_v47 = vpop.permute.xlu0 %2047  ;;  %4102 = vmatprep.subr.msk.bf16.mxu1 %vm516_vm0, %v4818_v36 }
  0xe9   :  { %v1927_v48 = vpop.permute.xlu1 %1926 }
  0xea   :  { %v3580_v26 = vcombine.low %v2079_v22, %v2080_v0  ;;  %v1935_v28 = vrot.slane %v1927_v48, %v4485_v49  ;;  %4146 = vset.pattern.permute.xlu1 %v5290_v23  ;;  %v2088_v0 = vmul.bf16 %v2012_v57, %v4571_v27  ;;  %v2034_v48 = vrot.slane %v4764_v55, %v4485_v49 }
  0xeb   :  { %2740 = vperm.xlu1 %4146, %v4314_v10   ;;  %3136 = vperm.xlu0 %4160, %v4326_v12  }
  0xec   :  { %v2081_v1 = vmul.bf16 %v1935_v28, %v4510_v63  ;;  %3899 = vmatprep.mubr.msk.bf16.mxu0 %vm491_vm1, %v3580_v26  ;;  %v2070_v8 = vpop.permute.xlu0 %2069  ;;  %v2090_v55 = vmul.bf16 %v2034_v48, %v4589_v17  ;;  %v2056_v28 = vrot.slane %v4776_v47, %v4485_v49 }
  0xed   :  { %v1949_v34 = vpop.permute.xlu1 %1948 }
  0xee   :  { %v3581_v43 = vcombine.low %v2081_v1, %v2082_v38  ;;  %v1957_v44 = vrot.slane %v1949_v34, %v4485_v49  ;;  %v2092_v54 = vmul.bf16 %v2056_v28, %v4611_v58 }
  0xef   :  { %2751 = vperm.xlu1 %4146, %v4309_v9   ;;  %4166 = vset.pattern.permute.xlu0 %v5292_v37 }
  0xf0   :  { %v2083_v41 = vmul.bf16 %v1957_v44, %v4534_v53  ;;  %3900 = vmatmul.mubr.msk.bf16.vlgmr.msra.gmra.mrb[0].mxu0 %vm491_vm1, %v3581_v43  ;;  %1629 = vperm.xlu0 %4166, %v4309_v9   ;;  %v2078_v43 = vrot.slane %v2070_v8, %v4485_v49 }
  0xf1   :  { %v1971_v60 = vpop.permute.xlu1 %1970  ;;  %v2290_v19 = vpop.permute.xlu0 %2289  ;;  %3916 = vmatpush3.bf16.msra.mxu0 %v2536_v35 }
  0xf2   :  { %v3582_v20 = vcombine.low %v2083_v41, %v2084_v31  ;;  %v1979_v22 = vrot.slane %v1971_v60, %v4485_v49  ;;  %4107 = vmatprep.subr.msk.bf16.mxu0 %vm516_vm0, %v4797_v32  ;;  %v2094_v57 = vmul.bf16 %v2078_v43, %v4631_v56 }
  0xf3   :  { %4147 = vset.pattern.permute.xlu1 %v5291_v59 }
  0xf4   :  { %v2085_v21 = vmul.bf16 %v1979_v22, %v4558_v62  ;;  %1189 = vperm.xlu1 %4147, %v4273_v3   ;;  %3903 = vmatprep.mubr.msk.bf16.mxu0 %vm491_vm1, %v3582_v20 }
  0xf5   :  { %v1993_v9 = vpop.permute.xlu1 %1992  ;;  %v4812_v30 = vpop.permute.xlu0 %2322  ;;  %1640 = vperm.xlu0 %4166, %v4326_v12  }
  0xf6   :  { %v3583_v38 = vcombine.low %v2085_v21, %v2086_v5  ;;  %v2001_v3 = vrot.slane %v1993_v9, %v4485_v49 }
  0xf8   :  { %v2087_v39 = vmul.bf16 %v2001_v3, %v4576_v46  ;;  %4148 = vset.pattern.permute.xlu1 %v5290_v23  ;;  %3904 = vmatmul.mubr.msk.bf16.gmra.mrb[4].mxu0 %vm491_vm1, %v3583_v38  ;;  %v813_v3 = vrot.slane %v4658_v45, %v4485_v49 }
  0xf9   :  { %2773 = vperm.xlu1 %4148, %v4321_v11   ;;  %v2015_v12 = vpop.permute.xlu1 %2014  ;;  %v4830_v26 = vpop.permute.xlu0 %2344  ;;  %1673 = vperm.xlu0 %4166, %v4333_v13  }
  0xfa   :  { %v3584_v1 = vcombine.low %v2087_v39, %v2088_v0  ;;  %v2023_v34 = vrot.slane %v2015_v12, %v4485_v49  ;;  %v959_v45 = vmul.bf16 %v813_v3, %v4510_v63 }
  0xfc   :  { %v2089_v35 = vmul.bf16 %v2023_v34, %v4594_v18  ;;  %3907 = vmatprep.mubr.msk.bf16.mxu0 %vm491_vm1, %v3584_v1  ;;  %v2331_v34 = vrot.slane %v4812_v30, %v4485_v49 }
  0xfd   :  { %4149 = vset.pattern.permute.xlu1 %v5291_v59  ;;  %v2037_v11 = vpop.permute.xlu1 %2036  ;;  %v4840_v31 = vpop.permute.xlu0 %2366  ;;  %1684 = vperm.xlu0 %4166, %v4350_v16  }
  0xfe   :  { %v3585_v44 = vcombine.low %v2089_v35, %v2090_v55  ;;  %v2045_v47 = vrot.slane %v2037_v11, %v4485_v49  ;;  %1200 = vperm.xlu1 %4149, %v4290_v6   ;;  %v2298_v6 = vrot.slane %v2290_v19, %v4485_v49  ;;  %v2457_v30 = vmul.bf16 %v2331_v34, %v4534_v53 }
 0x100   :  { %v2091_v41 = vmul.bf16 %v2045_v47, %v4616_v29  ;;  %3908 = vmatmul.mubr.msk.bf16.gmra.mrb[8].mxu0 %vm491_vm1, %v3585_v44  ;;  %v2454_v48 = vmul.bf16 %v2298_v6, %v4495_v51  ;;  %v1414_v47 = vsel %vm516_vm0, %v4818_v36, 0  ;;  %v2910_v36 = vsel %vm516_vm0, %v4797_v32, 0 }
 0x101   :  { %v2059_v60 = vpop.permute.xlu1 %2058  ;;  %v4849_v5 = vpop.permute.xlu0 %2388  ;;  %4171 = vset.pattern.permute.xlu0 %v4234_v33 }
 0x102   :  { %v3586_v20 = vcombine.low %v2091_v41, %v2092_v54  ;;  %v2067_v22 = vrot.slane %v2059_v60, %v4485_v49  ;;  %4150 = vset.pattern.permute.xlu1 %v5290_v23  ;;  %3180 = vperm.xlu0 %4171, %v4350_v16   ;;  %v824_v16 = vrot.slane %v4672_v4, %v4485_v49 }
 0x103   :  { %2784 = vperm.xlu1 %4150, %v4338_v14   ;;  %v791_v14 = vrot.slane %v4645_v42, %v4485_v49  ;;  %v2397_v3 = vrot.slane %v4849_v5, %v4485_v49  ;;  %v4174_v5 = vld [vmem:[%s5277_s0 + $0x4] sm:$0xf] }
 0x104   :  { %v2093_v8 = vmul.bf16 %v2067_v22, %v4636_v40  ;;  %3911 = vmatprep.mubr.msk.bf16.mxu0 %vm491_vm1, %v3586_v20 }
 0x105   :  { %v4860_v21 = vpop.permute.xlu0 %2432  ;;  %v957_v4 = vmul.bf16 %v791_v14, %v4490_v50 }
 0x106   :  { %v3587_v9 = vcombine.low %v2093_v8, %v2094_v57  ;;  %v2279_v0 = vpop.permute.xlu1 %2278  ;;  %v2353_v57 = vrot.slane %v4830_v26, %v4485_v49 }
 0x107   :  { %v2287_v38 = vrot.slane %v2279_v0, %v4485_v49  ;;  %2795 = vperm.xlu1 %4150, %v4333_v13   ;;  %v960_v13 = vmul.bf16 %v824_v16, %v4515_v2 }
 0x108   :  { %3912 = vmatmul.mubr.msk.bf16.gmra.mrb[12].mxu0 %vm491_vm1, %v3587_v9  ;;  %v2459_v32 = vmul.bf16 %v2353_v57, %v4558_v62 }
 0x109   :  { %v2453_v19 = vmul.bf16 %v2287_v38, %v4490_v50  ;;  %v3530_v44 = vcombine.low %v959_v45, %v960_v13  ;;  %v2463_v13 = vmul.bf16 %v2397_v3, %v4594_v18 }
 0x10a   :  { %v2301_v39 = vpop.permute.xlu1 %2300  ;;  %v794_v12 = vpop.permute.xlu0 %793 }
 0x10b   :  { %v3597_v55 = vcombine.low %v2453_v19, %v2454_v48  ;;  %v802_v28 = vrot.slane %v794_v12, %v4485_v49  ;;  %4151 = vset.pattern.permute.xlu1 %v5291_v59  ;;  %v2309_v42 = vrot.slane %v2301_v39, %v4485_v49  ;;  %v2375_v48 = vrot.slane %v4840_v31, %v4485_v49  ;;  %v4173_v12 = vld [vmem:[%s5277_s0] sm:$0xf] }
 0x10c   :  { %1233 = vperm.xlu1 %4151, %v4297_v7  }
 0x10d   :  { %v958_v1 = vmul.bf16 %v802_v28, %v4495_v51  ;;  %3917 = vmatprep.mubr.msk.bf16.mxu0 %vm491_vm1, %v3597_v55  ;;  %v2455_v41 = vmul.bf16 %v2309_v42, %v4510_v63 }
 0x10e   :  { %v2312_v35 = vpop.permute.xlu1 %2311  ;;  %v827_v11 = vpop.permute.xlu0 %826 }
 0x10f   :  { %v3529_v54 = vcombine.low %v957_v4, %v958_v1  ;;  %v2320_v43 = vrot.slane %v2312_v35, %v4485_v49  ;;  %v835_v7 = vrot.slane %v827_v11, %v4485_v49  ;;  %v4937_v35 = vld [vmem:[%s5277_s0 + $0x2c] sm:$0xf] }
 0x110   :  { %4153 = vset.pattern.permute.xlu1 %v5290_v23 }
 0x111   :  { %v2456_v60 = vmul.bf16 %v2320_v43, %v4515_v2  ;;  %2817 = vperm.xlu1 %4153, %v4345_v15   ;;  %3845 = vmatprep.mubr.msk.bf16.mxu1 %vm491_vm1, %v3529_v54  ;;  %v961_v8 = vmul.bf16 %v835_v7, %v4534_v53 }
 0x112   :  { %v2334_v20 = vpop.permute.xlu1 %2333  ;;  %3846 = vmatmul.mubr.msk.bf16.vlgmr.msra.gmra.mrb[0].mxu1 %vm491_vm1, %v3530_v44  ;;  %v838_v23 = vpop.permute.xlu0 %837 }
 0x113   :  { %v3598_v22 = vcombine.low %v2455_v41, %v2456_v60  ;;  %v2342_v6 = vrot.slane %v2334_v20, %v4485_v49  ;;  %v846_v15 = vrot.slane %v838_v23, %v4485_v49  ;;  %3862 = vmatpush3.bf16.msra.mxu1 %v1414_v47  ;;  %v4176_v60 = vld [vmem:[%s5277_s0 + $0xc] sm:$0xf] }
 0x114   :  { %4104 = vmatprep.subr.msk.bf16.mxu1 %vm516_vm0, %v4400_v24 }
 0x115   :  { %v2458_v26 = vmul.bf16 %v2342_v6, %v4529_v52  ;;  %4154 = vset.pattern.permute.xlu1 %v5291_v59  ;;  %3918 = vmatmul.mubr.msk.bf16.vlgmr.msra.gmra.mrb[0].mxu0 %vm491_vm1, %v3598_v22  ;;  %v962_v9 = vmul.bf16 %v846_v15, %v4529_v52  ;;  %v2441_v6 = vrot.slane %v4860_v21, %v4485_v49  ;;  %v4967_v15 = vld [vmem:[%s5277_s0 + $0x30] sm:$0xf] }
 0x116   :  { %1244 = vperm.xlu1 %4154, %v4314_v10   ;;  %v2356_v0 = vpop.permute.xlu1 %2355  ;;  %3934 = vmatpush3.bf16.msra.mxu0 %v2910_v36  ;;  %v2461_v10 = vmul.bf16 %v2375_v48, %v4576_v46  ;;  %v849_v54 = vpop.permute.xlu0 %848 }
 0x117   :  { %v3599_v38 = vcombine.low %v2457_v30, %v2458_v26  ;;  %v2364_v24 = vrot.slane %v2356_v0, %v4485_v49  ;;  %v3531_v16 = vcombine.low %v961_v8, %v962_v9  ;;  %v857_v44 = vrot.slane %v849_v54, %v4485_v49  ;;  %v4953_v30 = vld [vmem:[%s5279_s2 + $0x20] sm:$0xf] }
 0x118   :  { %4108 = vmatprep.subr.msk.bf16.mxu0 %vm516_vm0, %v4953_v30  ;;  %v2467_v0 = vmul.bf16 %v2441_v6, %v4636_v40 }
 0x119   :  { %v2460_v14 = vmul.bf16 %v2364_v24, %v4553_v61  ;;  %3921 = vmatprep.mubr.msk.bf16.mxu0 %vm491_vm1, %v3599_v38  ;;  %3849 = vmatprep.mubr.msk.bf16.mxu1 %vm491_vm1, %v3531_v16  ;;  %v963_v36 = vmul.bf16 %v857_v44, %v4558_v62  ;;  %v4178_v24 = vld [vmem:[%s5277_s0 + $0x10] sm:$0xf] }
 0x11a   :  { %4155 = vset.pattern.permute.xlu1 %v4234_v33  ;;  %v2378_v19 = vpop.permute.xlu1 %2377  ;;  %v882_v22 = vpop.permute.xlu0 %881 }
 0x11b   :  { %v3600_v39 = vcombine.low %v2459_v32, %v2460_v14  ;;  %v2386_v31 = vrot.slane %v2378_v19, %v4485_v49  ;;  %3026 = vperm.xlu1 %4155, %v4173_v12   ;;  %v890_v48 = vrot.slane %v882_v22, %v4485_v49 }
 0x11d   :  { %v2462_v55 = vmul.bf16 %v2386_v31, %v4571_v27  ;;  %3922 = vmatmul.mubr.msk.bf16.gmra.mrb[4].mxu0 %vm491_vm1, %v3600_v39  ;;  %v4179_v39 = vld [vmem:[%s5277_s0 + $0x14] sm:$0xf] }
 0x11e   :  { %v2400_v28 = vpop.permute.xlu1 %2399  ;;  %v893_v32 = vpop.permute.xlu0 %892 }
 0x11f   :  { %v3601_v4 = vcombine.low %v2461_v10, %v2462_v55  ;;  %v2408_v42 = vrot.slane %v2400_v28, %v4485_v49  ;;  %3037 = vperm.xlu1 %4155, %v4174_v5   ;;  %v966_v10 = vmul.bf16 %v890_v48, %v4571_v27  ;;  %v4990_v28 = vld [vmem:[%s5277_s0 + $0x3c] sm:$0xf] }
 0x121   :  { %v2464_v1 = vmul.bf16 %v2408_v42, %v4589_v17  ;;  %3925 = vmatprep.mubr.msk.bf16.mxu0 %vm491_vm1, %v3601_v4 }
 0x122   :  { %v2411_v45 = vpop.permute.xlu1 %2410  ;;  %v926_v3 = vpop.permute.xlu0 %925 }
 0x123   :  { %v3602_v34 = vcombine.low %v2463_v13, %v2464_v1  ;;  %4156 = vset.pattern.permute.xlu1 %v5291_v59  ;;  %v2419_v11 = vrot.slane %v2411_v45, %v4485_v49  ;;  %v901_v1 = vrot.slane %v893_v32, %v4485_v49 }
 0x124   :  { %1277 = vperm.xlu1 %4156, %v4937_v35  }
 0x125   :  { %3926 = vmatmul.mubr.msk.bf16.gmra.mrb[8].mxu0 %vm491_vm1, %v3602_v34  ;;  %v2465_v47 = vmul.bf16 %v2419_v11, %v4616_v29  ;;  %v4181_v34 = vld [vmem:[%s5277_s0 + $0x1c] sm:$0xf] }
 0x126   :  { %v2422_v43 = vpop.permute.xlu1 %2421  ;;  %v937_v13 = vpop.permute.xlu0 %936 }
 0x127   :  { %v2430_v7 = vrot.slane %v2422_v43, %v4485_v49 }
 0x128   :  { %4157 = vset.pattern.permute.xlu1 %v4234_v33 }
 0x129   :  { %v2466_v41 = vmul.bf16 %v2430_v7, %v4611_v58  ;;  %3059 = vperm.xlu1 %4157, %v4176_v60   ;;  %v967_v7 = vmul.bf16 %v901_v1, %v4594_v18 }
 0x12b   :  { %v3603_v57 = vcombine.low %v2465_v47, %v2466_v41  ;;  %v860_v20 = vpop.permute.xlu1 %859  ;;  %v2675_v11 = vpop.permute.xlu0 %2674  ;;  %v4182_v47 = vld [vmem:[%s5277_s0 + $0x20] sm:$0xf] }
 0x12c   :  { %v868_v23 = vrot.slane %v860_v20, %v4485_v49 }
 0x12d   :  { %4158 = vset.pattern.permute.xlu1 %v5291_v59  ;;  %3929 = vmatprep.mubr.msk.bf16.mxu0 %vm491_vm1, %v3603_v57 }
 0x12e   :  { %v964_v8 = vmul.bf16 %v868_v23, %v4553_v61  ;;  %1288 = vperm.xlu1 %4158, %v4967_v15   ;;  %v934_v23 = vrot.slane %v926_v3, %v4485_v49 }
 0x130   :  { %v3532_v26 = vcombine.low %v963_v36, %v964_v8  ;;  %v2444_v9 = vpop.permute.xlu1 %2443  ;;  %v2719_v8 = vpop.permute.xlu0 %2718 }
 0x131   :  { %v2452_v21 = vrot.slane %v2444_v9, %v4485_v49  ;;  %v970_v9 = vmul.bf16 %v934_v23, %v4611_v58 }
 0x132   :  { %4159 = vset.pattern.permute.xlu1 %v4234_v33  ;;  %3850 = vmatmul.mubr.msk.bf16.gmra.mrb[4].mxu1 %vm491_vm1, %v3532_v26  ;;  %v3284_v26 = vsel %vm516_vm0, %v4953_v30, 0 }
 0x133   :  { %v2468_v38 = vmul.bf16 %v2452_v21, %v4631_v56  ;;  %3070 = vperm.xlu1 %4159, %v4178_v24  }
 0x134   :  { %v5028_v48 = vpop.permute.xlu0 %2762 }
 0x135   :  { %v3604_v16 = vcombine.low %v2467_v0, %v2468_v38  ;;  %v871_v14 = vpop.permute.xlu1 %870 }
 0x136   :  { %v879_v19 = vrot.slane %v871_v14, %v4485_v49 }
 0x137   :  { %3081 = vperm.xlu1 %4159, %v4179_v39   ;;  %3930 = vmatmul.mubr.msk.bf16.gmra.mrb[12].mxu0 %vm491_vm1, %v3604_v16  ;;  %v945_v16 = vrot.slane %v937_v13, %v4485_v49 }
 0x138   :  { %v965_v31 = vmul.bf16 %v879_v19, %v4576_v46 }
 0x13a   :  { %v3533_v12 = vcombine.low %v965_v31, %v966_v10  ;;  %v2653_v55 = vpop.permute.xlu1 %2652  ;;  %v5039_v10 = vpop.permute.xlu0 %2806  ;;  %v971_v31 = vmul.bf16 %v945_v16, %v4636_v40 }
 0x13b   :  { %4161 = vset.pattern.permute.xlu1 %v5291_v59  ;;  %v2661_v4 = vrot.slane %v2653_v55, %v4485_v49  ;;  %v2727_v55 = vrot.slane %v2719_v8, %v4485_v49 }
 0x13c   :  { %1321 = vperm.xlu1 %4161, %v4990_v28   ;;  %3853 = vmatprep.mubr.msk.bf16.mxu1 %vm491_vm1, %v3533_v12 }
 0x13d   :  { %v2827_v59 = vmul.bf16 %v2661_v4, %v4490_v50  ;;  %v2683_v50 = vrot.slane %v2675_v11, %v4485_v49  ;;  %v2833_v4 = vmul.bf16 %v2727_v55, %v4558_v62  ;;  %v5059_v62 = vld [vmem:[%s5278_s1 + $0x4] sm:$0xf] }
 0x13e   :  { %v2664_v42 = vpop.permute.xlu1 %2663 }
 0x13f   :  { %v2672_v5 = vrot.slane %v2664_v42, %v4485_v49  ;;  %v2829_v20 = vmul.bf16 %v2683_v50, %v4510_v63  ;;  %v4183_v63 = vld [vmem:[%s5277_s0 + $0x24] sm:$0xf] }
 0x140   :  { %4162 = vset.pattern.permute.xlu1 %v4234_v33 }
 0x141   :  { %v2828_v45 = vmul.bf16 %v2672_v5, %v4495_v51  ;;  %3103 = vperm.xlu1 %4162, %v4181_v34  }
 0x143   :  { %v3614_v54 = vcombine.low %v2827_v59, %v2828_v45  ;;  %v904_v43 = vpop.permute.xlu1 %903 }
 0x144   :  { %v912_v44 = vrot.slane %v904_v43, %v4485_v49 }
 0x145   :  { %4163 = vset.pattern.permute.xlu1 %v5292_v37  ;;  %3935 = vmatprep.mubr.msk.bf16.mxu0 %vm491_vm1, %v3614_v54  ;;  %v4185_v54 = vld [vmem:[%s5277_s0 + $0x34] sm:$0xf] }
 0x146   :  { %v968_v51 = vmul.bf16 %v912_v44, %v4589_v17  ;;  %1618 = vperm.xlu1 %4163, %v4182_v47  }
 0x148   :  { %v3534_v41 = vcombine.low %v967_v7, %v968_v51  ;;  %v2686_v60 = vpop.permute.xlu1 %2685 }
 0x149   :  { %v2694_v57 = vrot.slane %v2686_v60, %v4485_v49 }
 0x14a   :  { %4164 = vset.pattern.permute.xlu1 %v4234_v33  ;;  %3854 = vmatmul.mubr.msk.bf16.gmra.mrb[8].mxu1 %vm491_vm1, %v3534_v41 }
 0x14b   :  { %v2830_v36 = vmul.bf16 %v2694_v57, %v4515_v2  ;;  %3114 = vperm.xlu1 %4164, %v4182_v47  }
 0x14d   :  { %v3615_v22 = vcombine.low %v2829_v20, %v2830_v36  ;;  %v915_v6 = vpop.permute.xlu1 %914  ;;  %v5086_v36 = vld [vmem:[%s5278_s1 + $0x8] sm:$0xf] }
 0x14e   :  { %v923_v32 = vrot.slane %v915_v6, %v4485_v49 }
 0x14f   :  { %3125 = vperm.xlu1 %4164, %v4183_v63   ;;  %3936 = vmatmul.mubr.msk.bf16.vlgmr.msra.gmra.mrb[0].mxu0 %vm491_vm1, %v3615_v22 }
 0x150   :  { %v969_v2 = vmul.bf16 %v923_v32, %v4616_v29  ;;  %3952 = vmatpush3.bf16.msra.mxu0 %v3284_v26 }
 0x152   :  { %v3535_v0 = vcombine.low %v969_v2, %v970_v9  ;;  %v2697_v21 = vpop.permute.xlu1 %2696 }
 0x153   :  { %4165 = vset.pattern.permute.xlu1 %v5292_v37  ;;  %v2705_v30 = vrot.slane %v2697_v21, %v4485_v49 }
 0x154   :  { %1651 = vperm.xlu1 %4165, %v4937_v35   ;;  %3857 = vmatprep.mubr.msk.bf16.mxu1 %vm491_vm1, %v3535_v0 }
 0x155   :  { %v2831_v14 = vmul.bf16 %v2705_v30, %v4534_v53  ;;  %v5115_v30 = vld [vmem:[%s5278_s1 + $0x10] sm:$0xf] }
 0x156   :  { %v2708_v38 = vpop.permute.xlu1 %2707 }
 0x157   :  { %v2716_v24 = vrot.slane %v2708_v38, %v4485_v49 }
 0x158   :  { %4167 = vset.pattern.permute.xlu1 %v4234_v33 }
 0x159   :  { %v2832_v19 = vmul.bf16 %v2716_v24, %v4529_v52  ;;  %3147 = vperm.xlu1 %4167, %v4937_v35   ;;  %v1168_v52 = vpop.permute.xlu0 %1167 }
 0x15a   :  { %v1176_v5 = vrot.slane %v1168_v52, %v4485_v49  ;;  %v5128_v52 = vld [vmem:[%s5278_s1 + $0x18] sm:$0xf] }
 0x15b   :  { %v3616_v3 = vcombine.low %v2831_v14, %v2832_v19  ;;  %v948_v39 = vpop.permute.xlu1 %947 }
 0x15c   :  { %v956_v12 = vrot.slane %v948_v39, %v4485_v49  ;;  %v1332_v11 = vmul.bf16 %v5059_v62, %v1176_v5 }
 0x15d   :  { %4168 = vset.pattern.permute.xlu1 %v5292_v37  ;;  %3939 = vmatprep.mubr.msk.bf16.mxu0 %vm491_vm1, %v3616_v3  ;;  %v1179_v50 = vpop.permute.xlu0 %1178 }
 0x15e   :  { %v972_v53 = vmul.bf16 %v956_v12, %v4631_v56  ;;  %1662 = vperm.xlu1 %4168, %v4967_v15   ;;  %v1187_v41 = vrot.slane %v1179_v50, %v4485_v49 }
 0x160   :  { %v3536_v35 = vcombine.low %v971_v31, %v972_v53  ;;  %v2730_v13 = vpop.permute.xlu1 %2729  ;;  %v1333_v22 = vmul.bf16 %v5086_v36, %v1187_v41 }
 0x161   :  { %v2738_v42 = vrot.slane %v2730_v13, %v4485_v49 }
 0x162   :  { %4169 = vset.pattern.permute.xlu1 %v4234_v33  ;;  %3858 = vmatmul.mubr.msk.bf16.gmra.mrb[12].mxu1 %vm491_vm1, %v3536_v35 }
 0x163   :  { %v2834_v1 = vmul.bf16 %v2738_v42, %v4553_v61  ;;  %3158 = vperm.xlu1 %4169, %v4967_v15   ;;  %v5069_v61 = vld [vmem:[%s5278_s1] sm:$0xf] }
 0x165   :  { %v3617_v59 = vcombine.low %v2833_v4, %v2834_v1  ;;  %v1157_v45 = vpop.permute.xlu1 %1156  ;;  %v2815_v4 = vrot.slane %v5039_v10, %v4485_v49 }
 0x166   :  { %v1165_v34 = vrot.slane %v1157_v45, %v4485_v49 }
 0x167   :  { %3169 = vperm.xlu1 %4169, %v4185_v54   ;;  %3940 = vmatmul.mubr.msk.bf16.gmra.mrb[4].mxu0 %vm491_vm1, %v3617_v59  ;;  %v2841_v59 = vmul.bf16 %v2815_v4, %v4636_v40 }
 0x168   :  { %v1331_v15 = vmul.bf16 %v5069_v61, %v1165_v34 }
 0x16a   :  { %v3546_v43 = vcombine.low %v1331_v15, %v1332_v11  ;;  %v2741_v7 = vpop.permute.xlu1 %2740 }
 0x16b   :  { %4170 = vset.pattern.permute.xlu1 %v5292_v37  ;;  %v2749_v44 = vrot.slane %v2741_v7, %v4485_v49 }
 0x16c   :  { %1695 = vperm.xlu1 %4170, %v4990_v28   ;;  %3863 = vmatprep.mubr.msk.bf16.mxu1 %vm491_vm1, %v3546_v43  ;;  %v5149_v43 = vld [vmem:[%s5278_s1 + $0x24] sm:$0xf] }
 0x16d   :  { %v2835_v60 = vmul.bf16 %v2749_v44, %v4576_v46  ;;  %v5156_v44 = vld [vmem:[%s5278_s1 + $0x20] sm:$0xf] }
 0x16e   :  { %v2752_v51 = vpop.permute.xlu1 %2751 }
 0x16f   :  { %v2760_v47 = vrot.slane %v2752_v51, %v4485_v49 }
 0x170   :  { %4172 = vset.pattern.permute.xlu1 %v4234_v33  ;;  %v2771_v33 = vrot.slane %v5028_v48, %v4485_v49  ;;  %v5108_v48 = vld [vmem:[%s5278_s1 + $0x14] sm:$0xf] }
 0x171   :  { %v2836_v57 = vmul.bf16 %v2760_v47, %v4571_v27  ;;  %3191 = vperm.xlu1 %4172, %v4990_v28   ;;  %v5095_v27 = vld [vmem:[%s5278_s1 + $0xc] sm:$0xf]  ;;  %v1212_v28 = vpop.permute.xlu0 %1211 }
 0x172   :  { %v2837_v26 = vmul.bf16 %v2771_v33, %v4594_v18  ;;  %v1220_v32 = vrot.slane %v1212_v28, %v4485_v49  ;;  %v5168_v28 = vld [vmem:[%s5278_s1 + $0x28] sm:$0xf] }
 0x173   :  { %v3618_v37 = vcombine.low %v2835_v60, %v2836_v57  ;;  %v1190_v20 = vpop.permute.xlu1 %1189 }
 0x174   :  { %v1198_v23 = vrot.slane %v1190_v20, %v4485_v49  ;;  %v1336_v18 = vmul.bf16 %v5108_v48, %v1220_v32 }
 0x175   :  { %3943 = vmatprep.mubr.msk.bf16.mxu0 %vm491_vm1, %v3618_v37  ;;  %v1223_v16 = vpop.permute.xlu0 %1222 }
 0x176   :  { %v1334_v46 = vmul.bf16 %v5095_v27, %v1198_v23  ;;  %v1231_v3 = vrot.slane %v1223_v16, %v4485_v49 }
 0x178   :  { %v3547_v6 = vcombine.low %v1333_v22, %v1334_v46  ;;  %v2774_v8 = vpop.permute.xlu1 %2773  ;;  %v1337_v35 = vmul.bf16 %v5128_v52, %v1231_v3 }
 0x179   :  { %v2782_v9 = vrot.slane %v2774_v8, %v4485_v49  ;;  %v1256_v13 = vpop.permute.xlu0 %1255 }
 0x17a   :  { %3864 = vmatmul.mubr.msk.bf16.vlgmr.msra.gmra.mrb[0].mxu1 %vm491_vm1, %v3547_v6  ;;  %v1264_v10 = vrot.slane %v1256_v13, %v4485_v49 }
 0x17b   :  { %v2838_v63 = vmul.bf16 %v2782_v9, %v4589_v17  ;;  %3970 = vmatpush3.bf16.msra.mxu1 %v4406_v25 }
 0x17c   :  { %v1340_v7 = vmul.bf16 %v5149_v43, %v1264_v10 }
 0x17d   :  { %v3619_v2 = vcombine.low %v2837_v26, %v2838_v63  ;;  %v1201_v0 = vpop.permute.xlu1 %1200  ;;  %v1267_v1 = vpop.permute.xlu0 %1266 }
 0x17e   :  { %v1209_v21 = vrot.slane %v1201_v0, %v4485_v49  ;;  %v1275_v37 = vrot.slane %v1267_v1, %v4485_v49 }
 0x17f   :  { %3944 = vmatmul.mubr.msk.bf16.gmra.mrb[8].mxu0 %vm491_vm1, %v3619_v2 }
 0x180   :  { %v1335_v25 = vmul.bf16 %v5115_v30, %v1209_v21  ;;  %v1341_v6 = vmul.bf16 %v5168_v28, %v1275_v37 }
 0x181   :  { %v1300_v40 = vpop.permute.xlu0 %1299 }
 0x182   :  { %v3548_v17 = vcombine.low %v1335_v25, %v1336_v18  ;;  %v2785_v38 = vpop.permute.xlu1 %2784  ;;  %v1308_v0 = vrot.slane %v1300_v40, %v4485_v49 }
 0x183   :  { %v2793_v24 = vrot.slane %v2785_v38, %v4485_v49 }
 0x184   :  { %3867 = vmatprep.mubr.msk.bf16.mxu1 %vm491_vm1, %v3548_v17  ;;  %v5188_v17 = vld [vmem:[%s5278_s1 + $0x34] sm:$0xf] }
 0x185   :  { %v2839_v39 = vmul.bf16 %v2793_v24, %v4616_v29  ;;  %v1311_v47 = vpop.permute.xlu0 %1310  ;;  %v1344_v38 = vmul.bf16 %v5188_v17, %v1308_v0 }
 0x186   :  { %v2796_v14 = vpop.permute.xlu1 %2795 }
 0x187   :  { %v2804_v19 = vrot.slane %v2796_v14, %v4485_v49 }
 0x189   :  { %v2840_v31 = vmul.bf16 %v2804_v19, %v4611_v58  ;;  %v5137_v58 = vld [vmem:[%s5278_s1 + $0x1c] sm:$0xf]  ;;  %v3049_v22 = vpop.permute.xlu0 %3048 }
 0x18a   :  { %v3057_v26 = vrot.slane %v3049_v22, %v4485_v49 }
 0x18b   :  { %v3620_v12 = vcombine.low %v2839_v39, %v2840_v31  ;;  %v1234_v55 = vpop.permute.xlu1 %1233 }
 0x18c   :  { %v1242_v53 = vrot.slane %v1234_v55, %v4485_v49  ;;  %v3203_v2 = vmul.bf16 %v5086_v36, %v3057_v26  ;;  %v5196_v36 = vld [vmem:[%s5278_s1 + $0x30] sm:$0xf] }
 0x18d   :  { %3947 = vmatprep.mubr.msk.bf16.mxu0 %vm491_vm1, %v3620_v12  ;;  %v3093_v19 = vpop.permute.xlu0 %3092 }
 0x18e   :  { %v1338_v29 = vmul.bf16 %v5137_v58, %v1242_v53 }
 0x190   :  { %v3549_v42 = vcombine.low %v1337_v35, %v1338_v29  ;;  %v2818_v5 = vpop.permute.xlu1 %2817  ;;  %v1319_v35 = vrot.slane %v1311_v47, %v4485_v49 }
 0x191   :  { %v2826_v45 = vrot.slane %v2818_v5, %v4485_v49  ;;  %v3137_v53 = vpop.permute.xlu0 %3136  ;;  %v5211_v5 = vld [vmem:[%s5278_s1 + $0x38] sm:$0xf] }
 0x192   :  { %3868 = vmatmul.mubr.msk.bf16.gmra.mrb[4].mxu1 %vm491_vm1, %v3549_v42  ;;  %v3101_v42 = vrot.slane %v3093_v19, %v4485_v49  ;;  %v3145_v26 = vrot.slane %v3137_v53, %v4485_v49 }
 0x193   :  { %v2842_v34 = vmul.bf16 %v2826_v45, %v4631_v56 }
 0x195   :  { %v3621_v11 = vcombine.low %v2841_v59, %v2842_v34  ;;  %v1245_v54 = vpop.permute.xlu1 %1244  ;;  %v1630_v59 = vpop.permute.xlu0 %1629  ;;  %v3207_v34 = vmul.bf16 %v5128_v52, %v3101_v42 }
 0x196   :  { %v1253_v15 = vrot.slane %v1245_v54, %v4485_v49  ;;  %v1638_v54 = vrot.slane %v1630_v59, %v4485_v49 }
 0x197   :  { %3948 = vmatmul.mubr.msk.bf16.gmra.mrb[12].mxu0 %vm491_vm1, %v3621_v11 }
 0x198   :  { %v1339_v56 = vmul.bf16 %v5156_v44, %v1253_v15 }
 0x19a   :  { %v3550_v50 = vcombine.low %v1339_v56, %v1340_v7  ;;  %v3027_v51 = vpop.permute.xlu1 %3026 }
 0x19b   :  { %v3035_v41 = vrot.slane %v3027_v51, %v4485_v49 }
 0x19c   :  { %3871 = vmatprep.mubr.msk.bf16.mxu1 %vm491_vm1, %v3550_v50  ;;  %v1714_v50 = vmul.bf16 %v5149_v43, %v1638_v54 }
 0x19d   :  { %v3201_v20 = vmul.bf16 %v5069_v61, %v3035_v41 }
 0x19e   :  { %v3038_v60 = vpop.permute.xlu1 %3037 }
 0x19f   :  { %v3046_v57 = vrot.slane %v3038_v60, %v4485_v49  ;;  %v1641_v60 = vpop.permute.xlu0 %1640 }
 0x1a0   :  { %v1649_v37 = vrot.slane %v1641_v60, %v4485_v49 }
 0x1a1   :  { %v3202_v23 = vmul.bf16 %v5059_v62, %v3046_v57  ;;  %v5177_v62 = vld [vmem:[%s5278_s1 + $0x2c] sm:$0xf] }
 0x1a3   :  { %v3631_v33 = vcombine.low %v3201_v20, %v3202_v23  ;;  %v1278_v46 = vpop.permute.xlu1 %1277 }
 0x1a4   :  { %v1286_v8 = vrot.slane %v1278_v46, %v4485_v49 }
 0x1a5   :  { %3953 = vmatprep.mubr.msk.bf16.mxu0 %vm491_vm1, %v3631_v33 }
 0x1a6   :  { %v1342_v61 = vmul.bf16 %v5177_v62, %v1286_v8 }
 0x1a8   :  { %v3551_v9 = vcombine.low %v1341_v6, %v1342_v61  ;;  %v3060_v32 = vpop.permute.xlu1 %3059  ;;  %v1715_v6 = vmul.bf16 %v5168_v28, %v1649_v37 }
 0x1a9   :  { %v3068_v63 = vrot.slane %v3060_v32, %v4485_v49 }
 0x1aa   :  { %3872 = vmatmul.mubr.msk.bf16.gmra.mrb[8].mxu1 %vm491_vm1, %v3551_v9 }
 0x1ab   :  { %v3204_v21 = vmul.bf16 %v5095_v27, %v3068_v63  ;;  %v1674_v63 = vpop.permute.xlu0 %1673 }
 0x1ad   :  { %v3632_v18 = vcombine.low %v3203_v2, %v3204_v21  ;;  %v1289_v25 = vpop.permute.xlu1 %1288 }
 0x1ae   :  { %v1297_v24 = vrot.slane %v1289_v25, %v4485_v49 }
 0x1af   :  { %3954 = vmatmul.mubr.msk.bf16.vlgmr.msra.gmra.mrb[0].mxu0 %vm491_vm1, %v3632_v18 }
 0x1b0   :  { %v1343_v27 = vmul.bf16 %v5196_v36, %v1297_v24 }
 0x1b2   :  { %v3552_v16 = vcombine.low %v1343_v27, %v1344_v38  ;;  %v3071_v14 = vpop.permute.xlu1 %3070 }
 0x1b3   :  { %v3079_v3 = vrot.slane %v3071_v14, %v4485_v49  ;;  %v1685_v14 = vpop.permute.xlu0 %1684 }
 0x1b4   :  { %3875 = vmatprep.mubr.msk.bf16.mxu1 %vm491_vm1, %v3552_v16 }
 0x1b5   :  { %v3205_v12 = vmul.bf16 %v5115_v30, %v3079_v3  ;;  %v1345_v30 = vmul.bf16 %v5211_v5, %v1319_v35 }
 0x1b6   :  { %v3082_v39 = vpop.permute.xlu1 %3081 }
 0x1b7   :  { %v3090_v31 = vrot.slane %v3082_v39, %v4485_v49  ;;  %v1693_v39 = vrot.slane %v1685_v14, %v4485_v49 }
 0x1b9   :  { %v3206_v55 = vmul.bf16 %v5108_v48, %v3090_v31  ;;  %v5217_v48 = vld [vmem:[%s5278_s1 + $0x3c] sm:$0xf]  ;;  %v3181_v31 = vpop.permute.xlu0 %3180  ;;  %s4235_s1 = smov [#allocation2]  }
 0x1ba   :  { %v3189_v35 = vrot.slane %v3181_v31, %v4485_v49  ;;  %s3484_s12 = sshll.u32 %s4235_s1, 4  ;;  %s3485_s12 = int_to_ptr.vmem [resolvable:$true] %s3484_s12 }
 0x1bb   :  { %v3633_v13 = vcombine.low %v3205_v12, %v3206_v55  ;;  %v1322_v4 = vpop.permute.xlu1 %1321  ;;  %s4201_s0 = scalar_lea.vmem %s3485_s12, 1024  ;;  %p4206_p1 = scmp.lt.s32.totalorder %s3485_s12, %s3485_s12 }
 0x1bc   :  { %v1330_v29 = vrot.slane %v1322_v4, %v4485_v49  ;;  %p4202_p0 = scmp.ne.s32.totalorder %s3485_s12, %s4201_s0  ;;  %p4207_p2 = scmp.lt.s32.totalorder %s4201_s0, %s4201_s0 }
 0x1bd   :  { %3957 = vmatprep.mubr.msk.bf16.mxu0 %vm491_vm1, %v3633_v13  ;;  %v1719_v13 = vmul.bf16 %v5211_v5, %v1693_v39 }
 0x1be   :  { %v1346_v1 = vmul.bf16 %v5217_v48, %v1330_v29  ;;  %p4208_p3 = por %p4207_p2, %p4206_p1 }
 0x1c0   :  { %v3553_v45 = vcombine.low %v1345_v30, %v1346_v1  ;;  %v3104_v10 = vpop.permute.xlu1 %3103  ;;  %p4209_p4 = pnand %p4208_p3, %p4202_p0 }
 0x1c1   :  { %v3112_v11 = vrot.slane %v3104_v10, %v4485_v49 }
 0x1c2   :  { %3876 = vmatmul.mubr.msk.bf16.gmra.mrb[12].mxu1 %vm491_vm1, %v3553_v45 }
 0x1c3   :  { %v3208_v15 = vmul.bf16 %v5137_v58, %v3112_v11 }
 0x1c5   :  { %v3634_v7 = vcombine.low %v3207_v34, %v3208_v15  ;;  %v1619_v40 = vpop.permute.xlu1 %1618 }
 0x1c6   :  { %v1627_v56 = vrot.slane %v1619_v40, %v4485_v49 }
 0x1c7   :  { %3958 = vmatmul.mubr.msk.bf16.gmra.mrb[4].mxu0 %vm491_vm1, %v3634_v7 }
 0x1c8   :  { %v1713_v51 = vmul.bf16 %v5156_v44, %v1627_v56 }
 0x1ca   :  { %v3567_v47 = vcombine.low %v1713_v51, %v1714_v50  ;;  %v3115_v52 = vpop.permute.xlu1 %3114 }
 0x1cb   :  { %v3123_v41 = vrot.slane %v3115_v52, %v4485_v49 }
 0x1cc   :  { %3889 = vmatprep.mubr.msk.bf16.mxu1 %vm491_vm1, %v3567_v47 }
 0x1cd   :  { %v3209_v20 = vmul.bf16 %v5156_v44, %v3123_v41  ;;  %v3211_v44 = vmul.bf16 %v5168_v28, %v3145_v26 }
 0x1ce   :  { %v3126_v57 = vpop.permute.xlu1 %3125 }
 0x1cf   :  { %v3134_v58 = vrot.slane %v3126_v57, %v4485_v49 }
 0x1d1   :  { %v3210_v23 = vmul.bf16 %v5149_v43, %v3134_v58  ;;  %v1682_v43 = vrot.slane %v1674_v63, %v4485_v49 }
 0x1d3   :  { %v3635_v22 = vcombine.low %v3209_v20, %v3210_v23  ;;  %v1652_v33 = vpop.permute.xlu1 %1651  ;;  %v1718_v18 = vmul.bf16 %v5188_v17, %v1682_v43 }
 0x1d4   :  { %v1660_v46 = vrot.slane %v1652_v33, %v4485_v49 }
 0x1d5   :  { %3961 = vmatprep.mubr.msk.bf16.mxu0 %vm491_vm1, %v3635_v22 }
 0x1d6   :  { %v1716_v8 = vmul.bf16 %v5177_v62, %v1660_v46 }
 0x1d8   :  { %v3568_v61 = vcombine.low %v1715_v6, %v1716_v8  ;;  %v3148_v9 = vpop.permute.xlu1 %3147 }
 0x1d9   :  { %v3156_v32 = vrot.slane %v3148_v9, %v4485_v49 }
 0x1da   :  { %3890 = vmatmul.mubr.msk.bf16.vlgmr.msra.gmra.mrb[8].mxu1 %vm491_vm1, %v3568_v61 }
 0x1db   :  { %v3212_v2 = vmul.bf16 %v5177_v62, %v3156_v32 }
 0x1dd   :  { %v3636_v0 = vcombine.low %v3211_v44, %v3212_v2  ;;  %v1663_v21 = vpop.permute.xlu1 %1662 }
 0x1de   :  { %v1671_v25 = vrot.slane %v1663_v21, %v4485_v49 }
 0x1df   :  { %3962 = vmatmul.mubr.msk.bf16.gmra.mrb[8].mxu0 %vm491_vm1, %v3636_v0 }
 0x1e0   :  { %v1717_v38 = vmul.bf16 %v5196_v36, %v1671_v25 }
 0x1e2   :  { %v3569_v24 = vcombine.low %v1717_v38, %v1718_v18  ;;  %v3159_v27 = vpop.permute.xlu1 %3158 }
 0x1e3   :  { %v3167_v16 = vrot.slane %v3159_v27, %v4485_v49 }
 0x1e4   :  { %3893 = vmatprep.mubr.msk.bf16.mxu1 %vm491_vm1, %v3569_v24 }
 0x1e5   :  { %v3213_v19 = vmul.bf16 %v5196_v36, %v3167_v16 }
 0x1e6   :  { %v3170_v28 = vpop.permute.xlu1 %3169 }
 0x1e7   :  { %v3178_v62 = vrot.slane %v3170_v28, %v4485_v49 }
 0x1e9   :  { %v3214_v3 = vmul.bf16 %v5188_v17, %v3178_v62  ;;  %v3215_v17 = vmul.bf16 %v5211_v5, %v3189_v35 }
 0x1eb   :  { %v3637_v12 = vcombine.low %v3213_v19, %v3214_v3  ;;  %v1696_v55 = vpop.permute.xlu1 %1695 }
 0x1ec   :  { %v1704_v53 = vrot.slane %v1696_v55, %v4485_v49 }
 0x1ed   :  { %3965 = vmatprep.mubr.msk.bf16.mxu0 %vm491_vm1, %v3637_v12 }
 0x1ee   :  { %v1720_v4 = vmul.bf16 %v5217_v48, %v1704_v53 }
 0x1f0   :  { %v3570_v29 = vcombine.low %v1719_v13, %v1720_v4  ;;  %v3192_v42 = vpop.permute.xlu1 %3191 }
 0x1f1   :  { %v3200_v36 = vrot.slane %v3192_v42, %v4485_v49 }
 0x1f2   :  { %3894 = vmatmul.mubr.msk.bf16.gmra.mrb[12].mxu1 %vm491_vm1, %v3570_v29 }
 0x1f3   :  { %v3216_v30 = vmul.bf16 %v5217_v48, %v3200_v36 }
 0x1f5   :  { %v3638_v1 = vcombine.low %v3215_v17, %v3216_v30 }
 0x1f7   :  { %3966 = vmatmul.mubr.msk.bf16.gmra.mrb[12].mxu0 %vm491_vm1, %v3638_v1 }
 0x24d   :  { %v3865_v59 = vpop.f32.mrb[0].mxu1 }
 0x24e   :  { %v1450_v45 = vpop.f32.mrb[1].mxu1 }
 0x24f   :  { %v3866_v10 = vpop.f32.mrb[2].mxu1 }
 0x250   :  { %v1453_v34 = vpop.f32.mrb[3].mxu1 }
 0x265   :  { %v3869_v11 = vpop.f32.mrb[4].mxu1 }
 0x266   :  { %v1466_v54 = vpop.f32.mrb[5].mxu1 }
 0x267   :  { %v3870_v15 = vpop.f32.mrb[6].mxu1 }
 0x268   :  { %v1469_v7 = vpop.f32.mrb[7].mxu1 }
 0x282   :  { %v3955_v40 = vpop.f32.mrb[0].mxu0 }
 0x283   :  { %v3971_v56 = vadd.f32 %v3955_v40, %v3865_v59  ;;  %v3320_v49 = vpop.f32.mrb[1].mxu0 }
 0x284   :  { %v3972_v50 = vadd.f32 %v3320_v49, %v1450_v45  ;;  %v3956_v5 = vpop.f32.mrb[2].mxu0 }
 0x285   :  { %v3973_v51 = vadd.f32 %v3956_v5, %v3866_v10  ;;  %v3323_v47 = vpop.f32.mrb[3].mxu0 }
 0x286   :  { %v3974_v52 = vadd.f32 %v3323_v47, %v1453_v34 }
 0x287   :  { %v3687_v48 = vpack.c.bf16 %v3973_v51, %v3971_v56 }
 0x288   :  { %v3682_v41 = vpack.c.bf16 %v3974_v52, %v3972_v50 }
 0x289   :  { %3719 = vst [vmem:[#allocation2 + $0x8] sm:$0xff] %v3687_v48  }
 0x28a   :  { %3683 = vst [vmem:[#allocation2] sm:$0xff] %v3682_v41  }
 0x29a   :  { %v3959_v60 = vpop.f32.mrb[4].mxu0 }
 0x29b   :  { %v3975_v57 = vadd.f32 %v3959_v60, %v3869_v11  ;;  %v3336_v58 = vpop.f32.mrb[5].mxu0 }
 0x29c   :  { %v3976_v37 = vadd.f32 %v3336_v58, %v1466_v54  ;;  %v3960_v20 = vpop.f32.mrb[6].mxu0 }
 0x29d   :  { %v3977_v23 = vadd.f32 %v3960_v20, %v3870_v15  ;;  %v3339_v22 = vpop.f32.mrb[7].mxu0 }
 0x29e   :  { %v3978_v33 = vadd.f32 %v3339_v22, %v1469_v7 }
 0x29f   :  { %v3697_v46 = vpack.c.bf16 %v3977_v23, %v3975_v57 }
 0x2a0   :  { %v3692_v6 = vpack.c.bf16 %v3978_v33, %v3976_v37 }
 0x2a1   :  { %3721 = vst [vmem:[#allocation2 + $0x18] sm:$0xff] %v3697_v46  }
 0x2a2   :  { %3720 = vst [vmem:[#allocation2 + $0x10] sm:$0xff] %v3692_v6  }
 0x2ad   :  { %v3891_v8 = vpop.f32.mrb[8].mxu1 }
 0x2ae   :  { %v1856_v26 = vpop.f32.mrb[9].mxu1 }
 0x2af   :  { %v3892_v61 = vpop.f32.mrb[10].mxu1 }
 0x2b0   :  { %v1859_v9 = vpop.f32.mrb[11].mxu1 }
 0x2b2   :  { %v3963_v32 = vpop.f32.mrb[8].mxu0 }
 0x2b3   :  { %v3979_v63 = vadd.f32 %v3963_v32, %v3891_v8  ;;  %v3352_v43 = vpop.f32.mrb[9].mxu0 }
 0x2b4   :  { %v3980_v44 = vadd.f32 %v3352_v43, %v1856_v26  ;;  %v3964_v2 = vpop.f32.mrb[10].mxu0 }
 0x2b5   :  { %v3981_v0 = vadd.f32 %v3964_v2, %v3892_v61  ;;  %v3355_v21 = vpop.f32.mrb[11].mxu0 }
 0x2b6   :  { %v3982_v18 = vadd.f32 %v3355_v21, %v1859_v9 }
 0x2b7   :  { %v3707_v25 = vpack.c.bf16 %v3981_v0, %v3979_v63 }
 0x2b8   :  { %v3702_v38 = vpack.c.bf16 %v3982_v18, %v3980_v44 }
 0x2b9   :  { %3723 = vst [vmem:[#allocation2 + $0x28] sm:$0xff] %v3707_v25  }
 0x2ba   :  { %3722 = vst [vmem:[#allocation2 + $0x20] sm:$0xff] %v3702_v38  }
 0x2c5   :  { %v3895_v24 = vpop.f32.mrb[12].mxu1 }
 0x2c6   :  { %v1872_v27 = vpop.f32.mrb[13].mxu1 }
 0x2c7   :  { %v3896_v16 = vpop.f32.mrb[14].mxu1 }
 0x2c8   :  { %v1875_v14 = vpop.f32.mrb[15].mxu1 }
 0x2ca   :  { %v3967_v28 = vpop.f32.mrb[12].mxu0 }
 0x2cb   :  { %v3983_v62 = vadd.f32 %v3967_v28, %v3895_v24  ;;  %v3368_v19 = vpop.f32.mrb[13].mxu0 }
 0x2cc   :  { %v3984_v3 = vadd.f32 %v3368_v19, %v1872_v27  ;;  %v3968_v39 = vpop.f32.mrb[14].mxu0 }
 0x2cd   :  { %v3985_v31 = vadd.f32 %v3968_v39, %v3896_v16  ;;  %v3371_v12 = vpop.f32.mrb[15].mxu0 }
 0x2ce   :  { %v3986_v55 = vadd.f32 %v3371_v12, %v1875_v14 }
 0x2cf   :  { %v3717_v53 = vpack.c.bf16 %v3985_v31, %v3983_v62 }
 0x2d0   :  { %v3712_v35 = vpack.c.bf16 %v3986_v55, %v3984_v3 }
 0x2d1   :  { %3725 = vst [vmem:[#allocation2 + $0x38] sm:$0xff] %v3717_v53  }
 0x2d2   :  { %3724 = vst [vmem:[#allocation2 + $0x30] sm:$0xff] %v3712_v35  }
 0x2d3   :  { %4212 = shalt.err (!%p4209_p4)
}
 0x2d4   :  { %s4213_s15 = scalar_lea.hbm %s5280_s3, 1024 }
 0x2d5   :  { %p4214_p5 = scmp.ne.s32.totalorder %s5280_s3, %s4213_s15  ;;  %p4217_p6 = scmp.lt.u32.totalorder %s4213_s15, %s5280_s3 }
 0x2d7   :  { %p4219_p7 = pnand %p4217_p6, %p4214_p5 }
 0x2d9   :  { %4222 = shalt.err (!%p4219_p7)
}
 0x2da   :  { %s4236_s20 = smov 64   ;;  %s4237_s2 = smov 4  }
 0x2db   :  { %3490 = dma.vmem_to_hbm [thread:$0]  %s3485_s12, 1024, %s5280_s3, [#allocation3], %s4236_s20, %s4236_s20, %s4237_s2  }
 0x2dc   :  { %4223 = dma.done.wait [#allocation3], 1024  }
 0x2dd   :  { %4224 = vsyncadd [#allocation3], 4294966272 }
 0x2de   :  { %3494 = vsyncpa [#allocation3], 1 }

</bundles_post_ra>
